<compile_context>
chip_gen: v7x
topology: tpu7x:2x2x1
jax: 0.10.0
libtpu: 0.0.40
codegen_flags: <defaults>
</compile_context>

<pallas_src>
import functools

import jax
import jax.numpy as jnp
import numpy as np
from jax.experimental import pallas as pl
from jax.experimental.pallas import tpu as pltpu


def _vae_kernel(ma_ref, state_ref, action_ref, eps_ref,
                ew1s_ref, ew1a_ref, eb1_ref,
                ew2_ref, eb2_ref,
                mw_ref, mb_ref, lw_ref, lb_ref,
                dw1s_ref, dw1z_ref, db1_ref,
                dw2_ref, db2_ref, dw3_ref, db3_ref,
                u_ref, mean_ref, std_ref, *, matmul_dtype):
    mm = matmul_dtype
    f32 = jnp.float32

    def dot(x, w_ref):
        # Weight refs are read at point of use (already in matmul dtype);
        # accumulate in f32 on the MXU.
        return jnp.dot(x, w_ref[...], preferred_element_type=f32)

    s = state_ref[...]        # (TB, S) in matmul dtype
    a = action_ref[...]       # (TB, A) in matmul dtype
    eps = eps_ref[...]        # (TB, L) f32

    # ---- encoder_shared: Linear(S+A, H) + ReLU, Linear(H, H) + ReLU ----
    h = dot(s, ew1s_ref) + dot(a, ew1a_ref) + eb1_ref[...]
    h = jnp.maximum(h, 0.0)
    h = jnp.maximum(dot(h.astype(mm), ew2_ref) + eb2_ref[...], 0.0)

    # ---- mean / log_std heads ----
    mean = dot(h.astype(mm), mw_ref) + mb_ref[...]
    log_std = jnp.clip(dot(h.astype(mm), lw_ref) + lb_ref[...], -4.0, 15.0)
    std = jnp.exp(log_std)                      # EUP, f32

    # ---- reparameterization: z = mean + std * eps ----
    z = mean + std * eps

    # ---- decoder: Linear(S+L,H)+ReLU, Linear(H,H)+ReLU, Linear(H,A)+Tanh ----
    d = dot(s, dw1s_ref) + dot(z.astype(mm), dw1z_ref) + db1_ref[...]
    d = jnp.maximum(d, 0.0)
    d = jnp.maximum(dot(d.astype(mm), dw2_ref) + db2_ref[...], 0.0)
    d = dot(d.astype(mm), dw3_ref) + db3_ref[...]
    u = ma_ref[0, 0] * jnp.tanh(d)

    # Concat-free output path: three whole-block stores, no lane relayout.
    u_ref[...] = u
    mean_ref[...] = mean
    std_ref[...] = std


def _pick_batch_tile(B):
    """Large batch tiles, multiple of 8 sublanes, >=2 grid steps when possible."""
    if B <= 8:
        return B
    tb = -(-B // 2)                 # at least two grid steps -> both TCs on v7x
    tb = ((tb + 7) // 8) * 8
    return min(1024, tb)


def vae_forward(state, action, eps, params, *, max_action,
                matmul_dtype=jnp.bfloat16):
    B, S = state.shape
    A = action.shape[1]
    L = eps.shape[1]
    H = params["ew2"].shape[0]
    mm = matmul_dtype

    w_names = ["ew1s", "ew1a", "ew2", "mw", "lw", "dw1s", "dw1z", "dw2", "dw3"]
    b_names = ["eb1", "eb2", "mb", "lb", "db1", "db2", "db3"]
    # Weights / batch activations in matmul dtype (halves DMA + VMEM for bf16);
    # biases and all elementwise math stay f32 (cheap on EUP/VPU, exact tail).
    weights = {k: params[k].astype(mm) for k in w_names}
    biases = {k: params[k].astype(jnp.float32) for k in b_names}
    state_c = state.astype(mm)
    action_c = action.astype(mm)
    eps_c = eps.astype(jnp.float32)
    ma = jnp.full((1, 1), max_action, dtype=jnp.float32)   # runtime SMEM scalar

    TB = _pick_batch_tile(B)
    grid = (pl.cdiv(B, TB),)
    bmap = lambda i: (i, 0)

    # Cost estimate (advisory for XLA scheduling around this small call).
    flops = 2 * B * (2 * S * H + A * H + 2 * H * H + 3 * H * L + H * A)
    transcendentals = B * (L + A)                           # exp + tanh
    arrays = ([state_c, action_c, eps_c]
              + [weights[k] for k in w_names] + [biases[k] for k in b_names])
    in_bytes = sum(int(np.prod(x.shape)) * jnp.dtype(x.dtype).itemsize for x in arrays)
    out_bytes = 4 * B * (A + 2 * L)
    cost = pl.CostEstimate(flops=flops, transcendentals=transcendentals,
                           bytes_accessed=in_bytes + out_bytes)

    # Explicit VMEM budget (matters at production H / on v7x's 64 MiB VMEM).
    w_bytes = sum(int(np.prod(weights[k].shape)) * jnp.dtype(mm).itemsize for k in w_names)
    b_bytes = sum(int(np.prod(biases[k].shape)) * 4 for k in b_names)
    tile_bytes = TB * ((S + A) * jnp.dtype(mm).itemsize + L * 4 + (A + 2 * L) * 4)
    act_bytes = 6 * TB * H * 4
    vmem_limit = int(min(64 << 20,
                         max(32 << 20, 4 * (w_bytes + b_bytes + 2 * tile_bytes + act_bytes))))

    kernel = functools.partial(_vae_kernel, matmul_dtype=mm)

    out_shape = (jax.ShapeDtypeStruct((B, A), jnp.float32),
                 jax.ShapeDtypeStruct((B, L), jnp.float32),
                 jax.ShapeDtypeStruct((B, L), jnp.float32))
    out_specs = (pl.BlockSpec((TB, A), bmap),
                 pl.BlockSpec((TB, L), bmap),
                 pl.BlockSpec((TB, L), bmap))

    def run(single_buffer_weights):
        def wspec(arr):
            # Constant index map -> weight block stays VMEM-resident across the
            # whole grid; single-buffer it to halve its VMEM footprint.
            if single_buffer_weights:
                return pl.BlockSpec(arr.shape, lambda i: (0, 0),
                                    pipeline_mode=pl.Buffered(buffer_count=1))
            return pl.BlockSpec(arr.shape, lambda i: (0, 0))

        in_specs = [
            pl.BlockSpec(memory_space=pltpu.MemorySpace.SMEM),   # max_action
            pl.BlockSpec((TB, S), bmap),
            pl.BlockSpec((TB, A), bmap),
            pl.BlockSpec((TB, L), bmap),
            wspec(weights["ew1s"]), wspec(weights["ew1a"]), wspec(biases["eb1"]),
            wspec(weights["ew2"]), wspec(biases["eb2"]),
            wspec(weights["mw"]), wspec(biases["mb"]),
            wspec(weights["lw"]), wspec(biases["lb"]),
            wspec(weights["dw1s"]), wspec(weights["dw1z"]), wspec(biases["db1"]),
            wspec(weights["dw2"]), wspec(biases["db2"]),
            wspec(weights["dw3"]), wspec(biases["db3"]),
        ]
        return pl.pallas_call(
            kernel,
            out_shape=out_shape,
            grid=grid,
            in_specs=in_specs,
            out_specs=out_specs,
            compiler_params=pltpu.CompilerParams(
                dimension_semantics=("parallel",),
                vmem_limit_bytes=vmem_limit),
            cost_estimate=cost,
        )(ma, state_c, action_c, eps_c,
          weights["ew1s"], weights["ew1a"], biases["eb1"],
          weights["ew2"], biases["eb2"],
          weights["mw"], biases["mb"],
          weights["lw"], biases["lb"],
          weights["dw1s"], weights["dw1z"], biases["db1"],
          weights["dw2"], biases["db2"],
          weights["dw3"], biases["db3"])

    try:
        u, mean, std = run(single_buffer_weights=True)
    except Exception:
        # pipeline_mode=pl.Buffered(1) not supported in this JAX build; fall back
        # to default double-buffered (constant-index) weight blocks.
        u, mean, std = run(single_buffer_weights=False)
    return u, mean, std


def init_params(key, state_dim, action_dim, latent_dim, hidden_dim):
    """Deterministic synthetic parameters (shapes follow the PyTorch module)."""
    ks = jax.random.split(key, 14)

    def lin(kw, kb, fan_in, fan_out):
        # PyTorch Linear default init: U(-1/sqrt(fan_in), 1/sqrt(fan_in))
        bound = 1.0 / np.sqrt(fan_in)
        w = jax.random.uniform(kw, (fan_in, fan_out), jnp.float32, -bound, bound)
        b = jax.random.uniform(kb, (1, fan_out), jnp.float32, -bound, bound)
        return w, b

    ew1, eb1 = lin(ks[0], ks[1], state_dim + action_dim, hidden_dim)
    ew2, eb2 = lin(ks[2], ks[3], hidden_dim, hidden_dim)
    mw, mb = lin(ks[4], ks[5], hidden_dim, latent_dim)
    lw, lb = lin(ks[6], ks[7], hidden_dim, latent_dim)
    dw1, db1 = lin(ks[8], ks[9], state_dim + latent_dim, hidden_dim)
    dw2, db2 = lin(ks[10], ks[11], hidden_dim, hidden_dim)
    dw3, db3 = lin(ks[12], ks[13], hidden_dim, action_dim)

    return {
        "ew1s": ew1[:state_dim], "ew1a": ew1[state_dim:], "eb1": eb1,
        "ew2": ew2, "eb2": eb2,
        "mw": mw, "mb": mb,
        "lw": lw, "lb": lb,
        "dw1s": dw1[:state_dim], "dw1z": dw1[state_dim:], "db1": db1,
        "dw2": dw2, "db2": db2,
        "dw3": dw3, "db3": db3,
    }


def vae_forward_ref(state, action, eps, p, *, max_action):
    """Pure-JAX reference (mirrors the PyTorch forward exactly)."""
    h = jnp.maximum(state @ p["ew1s"] + action @ p["ew1a"] + p["eb1"], 0.0)
    h = jnp.maximum(h @ p["ew2"] + p["eb2"], 0.0)
    mean = h @ p["mw"] + p["mb"]
    log_std = jnp.clip(h @ p["lw"] + p["lb"], -4.0, 15.0)
    std = jnp.exp(log_std)
    z = mean + std * eps
    d = jnp.maximum(state @ p["dw1s"] + z @ p["dw1z"] + p["db1"], 0.0)
    d = jnp.maximum(d @ p["dw2"] + p["db2"], 0.0)
    u = max_action * jnp.tanh(d @ p["dw3"] + p["db3"])
    return u, mean, std


if __name__ == "__main__":
    # Small shapes consistent with the module (B=16 -> 2 grid steps of 8 rows).
    B, STATE_DIM, ACTION_DIM, HIDDEN_DIM = 16, 16, 8, 32
    LATENT_DIM = 2 * ACTION_DIM
    MAX_ACTION = 1.0

    key = jax.random.PRNGKey(0)
    k_state, k_action, k_eps, k_params = jax.random.split(key, 4)

    state = jax.random.normal(k_state, (B, STATE_DIM), jnp.float32)
    action = jax.random.normal(k_action, (B, ACTION_DIM), jnp.float32)
    # torch.randn_like(std) -> precomputed noise fed into the kernel.
    eps = jax.random.normal(k_eps, (B, LATENT_DIM), jnp.float32)

    params = init_params(k_params, STATE_DIM, ACTION_DIM, LATENT_DIM, HIDDEN_DIM)

    u_r, mean_r, std_r = vae_forward_ref(state, action, eps, params,
                                         max_action=MAX_ACTION)

    # Exact-precision path (f32 matmuls) -> tight tolerance vs. reference.
    u, mean, std = vae_forward(state, action, eps, params,
                               max_action=MAX_ACTION, matmul_dtype=jnp.float32)
    jax.block_until_ready((u, mean, std))
    np.testing.assert_allclose(np.asarray(u), np.asarray(u_r), rtol=1e-5, atol=1e-5)
    np.testing.assert_allclose(np.asarray(mean), np.asarray(mean_r), rtol=1e-5, atol=1e-5)
    np.testing.assert_allclose(np.asarray(std), np.asarray(std_r), rtol=1e-5, atol=1e-5)

    # Default bf16-matmul path (recommended for v6e/v7x) -> loose tolerance.
    u_b, mean_b, std_b = vae_forward(state, action, eps, params,
                                     max_action=MAX_ACTION)
    jax.block_until_ready((u_b, mean_b, std_b))
    np.testing.assert_allclose(np.asarray(u_b), np.asarray(u_r), rtol=5e-2, atol=5e-2)
    np.testing.assert_allclose(np.asarray(mean_b), np.asarray(mean_r), rtol=5e-2, atol=5e-2)
    np.testing.assert_allclose(np.asarray(std_b), np.asarray(std_r), rtol=5e-2, atol=5e-2)

    print("KERNEL_OK")
</pallas_src>

<mosaic_0001>
module attributes {stable_mosaic.version = 11 : i64} {
  func.func @_vae_kernel(%arg0: i32, %arg1: memref<1x1xf32, #tpu.memory_space<smem>>, %arg2: memref<8x16xf32, #tpu.memory_space<vmem>>, %arg3: memref<8x8xf32, #tpu.memory_space<vmem>>, %arg4: memref<8x16xf32, #tpu.memory_space<vmem>>, %arg5: memref<16x32xf32, #tpu.memory_space<vmem>>, %arg6: memref<8x32xf32, #tpu.memory_space<vmem>>, %arg7: memref<1x32xf32, #tpu.memory_space<vmem>>, %arg8: memref<32x32xf32, #tpu.memory_space<vmem>>, %arg9: memref<1x32xf32, #tpu.memory_space<vmem>>, %arg10: memref<32x16xf32, #tpu.memory_space<vmem>>, %arg11: memref<1x16xf32, #tpu.memory_space<vmem>>, %arg12: memref<32x16xf32, #tpu.memory_space<vmem>>, %arg13: memref<1x16xf32, #tpu.memory_space<vmem>>, %arg14: memref<16x32xf32, #tpu.memory_space<vmem>>, %arg15: memref<16x32xf32, #tpu.memory_space<vmem>>, %arg16: memref<1x32xf32, #tpu.memory_space<vmem>>, %arg17: memref<32x32xf32, #tpu.memory_space<vmem>>, %arg18: memref<1x32xf32, #tpu.memory_space<vmem>>, %arg19: memref<32x8xf32, #tpu.memory_space<vmem>>, %arg20: memref<1x8xf32, #tpu.memory_space<vmem>>, %arg21: memref<8x8xf32, #tpu.memory_space<vmem>>, %arg22: memref<8x16xf32, #tpu.memory_space<vmem>>, %arg23: memref<8x16xf32, #tpu.memory_space<vmem>>) attributes {dimension_semantics = [#tpu.dimension_semantics<parallel>], iteration_bounds = array<i64: 2>, scalar_prefetch = 0 : i64, scratch_operands = 0 : i64, tpu.core_type = #tpu.core_type<tc>, window_params = [{transform_indices = @transform_0, window_bounds = array<i64: 1, 1>}, {transform_indices = @transform_1, window_bounds = array<i64: 8, 16>}, {transform_indices = @transform_2, window_bounds = array<i64: 8, 8>}, {transform_indices = @transform_3, window_bounds = array<i64: 8, 16>}, {pipeline_mode = #tpu.pipeline_mode<synchronous>, transform_indices = @transform_4, window_bounds = array<i64: 16, 32>}, {pipeline_mode = #tpu.pipeline_mode<synchronous>, transform_indices = @transform_5, window_bounds = array<i64: 8, 32>}, {pipeline_mode = #tpu.pipeline_mode<synchronous>, transform_indices = @transform_6, window_bounds = array<i64: 1, 32>}, {pipeline_mode = #tpu.pipeline_mode<synchronous>, transform_indices = @transform_7, window_bounds = array<i64: 32, 32>}, {pipeline_mode = #tpu.pipeline_mode<synchronous>, transform_indices = @transform_8, window_bounds = array<i64: 1, 32>}, {pipeline_mode = #tpu.pipeline_mode<synchronous>, transform_indices = @transform_9, window_bounds = array<i64: 32, 16>}, {pipeline_mode = #tpu.pipeline_mode<synchronous>, transform_indices = @transform_10, window_bounds = array<i64: 1, 16>}, {pipeline_mode = #tpu.pipeline_mode<synchronous>, transform_indices = @transform_11, window_bounds = array<i64: 32, 16>}, {pipeline_mode = #tpu.pipeline_mode<synchronous>, transform_indices = @transform_12, window_bounds = array<i64: 1, 16>}, {pipeline_mode = #tpu.pipeline_mode<synchronous>, transform_indices = @transform_13, window_bounds = array<i64: 16, 32>}, {pipeline_mode = #tpu.pipeline_mode<synchronous>, transform_indices = @transform_14, window_bounds = array<i64: 16, 32>}, {pipeline_mode = #tpu.pipeline_mode<synchronous>, transform_indices = @transform_15, window_bounds = array<i64: 1, 32>}, {pipeline_mode = #tpu.pipeline_mode<synchronous>, transform_indices = @transform_16, window_bounds = array<i64: 32, 32>}, {pipeline_mode = #tpu.pipeline_mode<synchronous>, transform_indices = @transform_17, window_bounds = array<i64: 1, 32>}, {pipeline_mode = #tpu.pipeline_mode<synchronous>, transform_indices = @transform_18, window_bounds = array<i64: 32, 8>}, {pipeline_mode = #tpu.pipeline_mode<synchronous>, transform_indices = @transform_19, window_bounds = array<i64: 1, 8>}, {transform_indices = @transform_20, window_bounds = array<i64: 8, 8>}, {transform_indices = @transform_21, window_bounds = array<i64: 8, 16>}, {transform_indices = @transform_22, window_bounds = array<i64: 8, 16>}]} {
    %c0 = arith.constant 0 : index
    %c0_0 = arith.constant 0 : index
    %0 = vector.load %arg2[%c0, %c0_0] : memref<8x16xf32, #tpu.memory_space<vmem>>, vector<8x16xf32>
    %c0_1 = arith.constant 0 : index
    %c0_2 = arith.constant 0 : index
    %1 = vector.load %arg3[%c0_1, %c0_2] : memref<8x8xf32, #tpu.memory_space<vmem>>, vector<8x8xf32>
    %c0_3 = arith.constant 0 : index
    %c0_4 = arith.constant 0 : index
    %2 = vector.load %arg4[%c0_3, %c0_4] : memref<8x16xf32, #tpu.memory_space<vmem>>, vector<8x16xf32>
    %c0_5 = arith.constant 0 : index
    %c0_6 = arith.constant 0 : index
    %3 = vector.load %arg5[%c0_5, %c0_6] : memref<16x32xf32, #tpu.memory_space<vmem>>, vector<16x32xf32>
    %cst = arith.constant dense<0.000000e+00> : vector<8x32xf32>
    %4 = tpu.matmul %0, %3, %cst {dimension_numbers = #tpu.dot_dimension_numbers<[1], [0], [0], [1], [0, 0, 1, 1], [], []>} : vector<8x16xf32>, vector<16x32xf32>, vector<8x32xf32> -> vector<8x32xf32>
    %c0_7 = arith.constant 0 : index
    %c0_8 = arith.constant 0 : index
    %5 = vector.load %arg6[%c0_7, %c0_8] : memref<8x32xf32, #tpu.memory_space<vmem>>, vector<8x32xf32>
    %cst_9 = arith.constant dense<0.000000e+00> : vector<8x32xf32>
    %6 = tpu.matmul %1, %5, %cst_9 {dimension_numbers = #tpu.dot_dimension_numbers<[1], [0], [0], [1], [0, 0, 1, 1], [], []>} : vector<8x8xf32>, vector<8x32xf32>, vector<8x32xf32> -> vector<8x32xf32>
    %7 = arith.addf %4, %6 : vector<8x32xf32>
    %c0_10 = arith.constant 0 : index
    %c0_11 = arith.constant 0 : index
    %8 = vector.load %arg7[%c0_10, %c0_11] : memref<1x32xf32, #tpu.memory_space<vmem>>, vector<1x32xf32>
    %9 = vector.broadcast %8 : vector<1x32xf32> to vector<8x32xf32>
    %10 = arith.addf %7, %9 : vector<8x32xf32>
    %cst_12 = arith.constant 0.000000e+00 : f32
    %11 = vector.broadcast %cst_12 : f32 to vector<8x32xf32>
    %12 = arith.maximumf %10, %11 : vector<8x32xf32>
    %c0_13 = arith.constant 0 : index
    %c0_14 = arith.constant 0 : index
    %13 = vector.load %arg8[%c0_13, %c0_14] : memref<32x32xf32, #tpu.memory_space<vmem>>, vector<32x32xf32>
    %cst_15 = arith.constant dense<0.000000e+00> : vector<8x32xf32>
    %14 = tpu.matmul %12, %13, %cst_15 {dimension_numbers = #tpu.dot_dimension_numbers<[1], [0], [0], [1], [0, 0, 1, 1], [], []>} : vector<8x32xf32>, vector<32x32xf32>, vector<8x32xf32> -> vector<8x32xf32>
    %c0_16 = arith.constant 0 : index
    %c0_17 = arith.constant 0 : index
    %15 = vector.load %arg9[%c0_16, %c0_17] : memref<1x32xf32, #tpu.memory_space<vmem>>, vector<1x32xf32>
    %16 = vector.broadcast %15 : vector<1x32xf32> to vector<8x32xf32>
    %17 = arith.addf %14, %16 : vector<8x32xf32>
    %cst_18 = arith.constant 0.000000e+00 : f32
    %18 = vector.broadcast %cst_18 : f32 to vector<8x32xf32>
    %19 = arith.maximumf %17, %18 : vector<8x32xf32>
    %c0_19 = arith.constant 0 : index
    %c0_20 = arith.constant 0 : index
    %20 = vector.load %arg10[%c0_19, %c0_20] : memref<32x16xf32, #tpu.memory_space<vmem>>, vector<32x16xf32>
    %cst_21 = arith.constant dense<0.000000e+00> : vector<8x16xf32>
    %21 = tpu.matmul %19, %20, %cst_21 {dimension_numbers = #tpu.dot_dimension_numbers<[1], [0], [0], [1], [0, 0, 1, 1], [], []>} : vector<8x32xf32>, vector<32x16xf32>, vector<8x16xf32> -> vector<8x16xf32>
    %c0_22 = arith.constant 0 : index
    %c0_23 = arith.constant 0 : index
    %22 = vector.load %arg11[%c0_22, %c0_23] : memref<1x16xf32, #tpu.memory_space<vmem>>, vector<1x16xf32>
    %23 = vector.broadcast %22 : vector<1x16xf32> to vector<8x16xf32>
    %24 = arith.addf %21, %23 : vector<8x16xf32>
    %c0_24 = arith.constant 0 : index
    %c0_25 = arith.constant 0 : index
    %25 = vector.load %arg12[%c0_24, %c0_25] : memref<32x16xf32, #tpu.memory_space<vmem>>, vector<32x16xf32>
    %cst_26 = arith.constant dense<0.000000e+00> : vector<8x16xf32>
    %26 = tpu.matmul %19, %25, %cst_26 {dimension_numbers = #tpu.dot_dimension_numbers<[1], [0], [0], [1], [0, 0, 1, 1], [], []>} : vector<8x32xf32>, vector<32x16xf32>, vector<8x16xf32> -> vector<8x16xf32>
    %c0_27 = arith.constant 0 : index
    %c0_28 = arith.constant 0 : index
    %27 = vector.load %arg13[%c0_27, %c0_28] : memref<1x16xf32, #tpu.memory_space<vmem>>, vector<1x16xf32>
    %28 = vector.broadcast %27 : vector<1x16xf32> to vector<8x16xf32>
    %29 = arith.addf %26, %28 : vector<8x16xf32>
    %cst_29 = arith.constant -4.000000e+00 : f32
    %cst_30 = arith.constant 1.500000e+01 : f32
    %30 = vector.broadcast %cst_29 : f32 to vector<8x16xf32>
    %31 = arith.maximumf %30, %29 : vector<8x16xf32>
    %32 = vector.broadcast %cst_30 : f32 to vector<8x16xf32>
    %33 = arith.minimumf %32, %31 : vector<8x16xf32>
    %34 = math.exp %33 : vector<8x16xf32>
    %35 = arith.mulf %34, %2 : vector<8x16xf32>
    %36 = arith.addf %24, %35 : vector<8x16xf32>
    %c0_31 = arith.constant 0 : index
    %c0_32 = arith.constant 0 : index
    %37 = vector.load %arg14[%c0_31, %c0_32] : memref<16x32xf32, #tpu.memory_space<vmem>>, vector<16x32xf32>
    %cst_33 = arith.constant dense<0.000000e+00> : vector<8x32xf32>
    %38 = tpu.matmul %0, %37, %cst_33 {dimension_numbers = #tpu.dot_dimension_numbers<[1], [0], [0], [1], [0, 0, 1, 1], [], []>} : vector<8x16xf32>, vector<16x32xf32>, vector<8x32xf32> -> vector<8x32xf32>
    %c0_34 = arith.constant 0 : index
    %c0_35 = arith.constant 0 : index
    %39 = vector.load %arg15[%c0_34, %c0_35] : memref<16x32xf32, #tpu.memory_space<vmem>>, vector<16x32xf32>
    %cst_36 = arith.constant dense<0.000000e+00> : vector<8x32xf32>
    %40 = tpu.matmul %36, %39, %cst_36 {dimension_numbers = #tpu.dot_dimension_numbers<[1], [0], [0], [1], [0, 0, 1, 1], [], []>} : vector<8x16xf32>, vector<16x32xf32>, vector<8x32xf32> -> vector<8x32xf32>
    %41 = arith.addf %38, %40 : vector<8x32xf32>
    %c0_37 = arith.constant 0 : index
    %c0_38 = arith.constant 0 : index
    %42 = vector.load %arg16[%c0_37, %c0_38] : memref<1x32xf32, #tpu.memory_space<vmem>>, vector<1x32xf32>
    %43 = vector.broadcast %42 : vector<1x32xf32> to vector<8x32xf32>
    %44 = arith.addf %41, %43 : vector<8x32xf32>
    %cst_39 = arith.constant 0.000000e+00 : f32
    %45 = vector.broadcast %cst_39 : f32 to vector<8x32xf32>
    %46 = arith.maximumf %44, %45 : vector<8x32xf32>
    %c0_40 = arith.constant 0 : index
    %c0_41 = arith.constant 0 : index
    %47 = vector.load %arg17[%c0_40, %c0_41] : memref<32x32xf32, #tpu.memory_space<vmem>>, vector<32x32xf32>
    %cst_42 = arith.constant dense<0.000000e+00> : vector<8x32xf32>
    %48 = tpu.matmul %46, %47, %cst_42 {dimension_numbers = #tpu.dot_dimension_numbers<[1], [0], [0], [1], [0, 0, 1, 1], [], []>} : vector<8x32xf32>, vector<32x32xf32>, vector<8x32xf32> -> vector<8x32xf32>
    %c0_43 = arith.constant 0 : index
    %c0_44 = arith.constant 0 : index
    %49 = vector.load %arg18[%c0_43, %c0_44] : memref<1x32xf32, #tpu.memory_space<vmem>>, vector<1x32xf32>
    %50 = vector.broadcast %49 : vector<1x32xf32> to vector<8x32xf32>
    %51 = arith.addf %48, %50 : vector<8x32xf32>
    %cst_45 = arith.constant 0.000000e+00 : f32
    %52 = vector.broadcast %cst_45 : f32 to vector<8x32xf32>
    %53 = arith.maximumf %51, %52 : vector<8x32xf32>
    %c0_46 = arith.constant 0 : index
    %c0_47 = arith.constant 0 : index
    %54 = vector.load %arg19[%c0_46, %c0_47] : memref<32x8xf32, #tpu.memory_space<vmem>>, vector<32x8xf32>
    %cst_48 = arith.constant dense<0.000000e+00> : vector<8x8xf32>
    %55 = tpu.matmul %53, %54, %cst_48 {dimension_numbers = #tpu.dot_dimension_numbers<[1], [0], [0], [1], [0, 0, 1, 1], [], []>} : vector<8x32xf32>, vector<32x8xf32>, vector<8x8xf32> -> vector<8x8xf32>
    %c0_49 = arith.constant 0 : index
    %c0_50 = arith.constant 0 : index
    %56 = vector.load %arg20[%c0_49, %c0_50] : memref<1x8xf32, #tpu.memory_space<vmem>>, vector<1x8xf32>
    %57 = vector.broadcast %56 : vector<1x8xf32> to vector<8x8xf32>
    %58 = arith.addf %55, %57 : vector<8x8xf32>
    %c0_51 = arith.constant 0 : index
    %c0_52 = arith.constant 0 : index
    %59 = memref.load %arg1[%c0_51, %c0_52] : memref<1x1xf32, #tpu.memory_space<smem>>
    %60 = math.tanh %58 : vector<8x8xf32>
    %61 = vector.broadcast %59 : f32 to vector<8x8xf32>
    %62 = arith.mulf %61, %60 : vector<8x8xf32>
    %c0_53 = arith.constant 0 : index
    %c0_54 = arith.constant 0 : index
    %63 = vector.load %arg21[%c0_53, %c0_54] : memref<8x8xf32, #tpu.memory_space<vmem>>, vector<8x8xf32>
    tpu.vector_store %arg21[%c0_53, %c0_54], %62 {strides = array<i32>} : memref<8x8xf32, #tpu.memory_space<vmem>>, vector<8x8xf32>,
    %c0_55 = arith.constant 0 : index
    %c0_56 = arith.constant 0 : index
    %64 = vector.load %arg22[%c0_55, %c0_56] : memref<8x16xf32, #tpu.memory_space<vmem>>, vector<8x16xf32>
    tpu.vector_store %arg22[%c0_55, %c0_56], %24 {strides = array<i32>} : memref<8x16xf32, #tpu.memory_space<vmem>>, vector<8x16xf32>,
    %c0_57 = arith.constant 0 : index
    %c0_58 = arith.constant 0 : index
    %65 = vector.load %arg23[%c0_57, %c0_58] : memref<8x16xf32, #tpu.memory_space<vmem>>, vector<8x16xf32>
    tpu.vector_store %arg23[%c0_57, %c0_58], %34 {strides = array<i32>} : memref<8x16xf32, #tpu.memory_space<vmem>>, vector<8x16xf32>,
    return
  }
  func.func @transform_0(%arg0: i32) -> (i32, i32) {
    %c0_i32 = arith.constant 0 : i32
    %c0_i32_0 = arith.constant 0 : i32
    %c0_i32_1 = arith.constant 0 : i32
    return %c0_i32, %c0_i32_0 : i32, i32
  }
  func.func @transform_1(%arg0: i32) -> (i32, i32) {
    %c0_i32 = arith.constant 0 : i32
    %c0_i32_0 = arith.constant 0 : i32
    return %arg0, %c0_i32 : i32, i32
  }
  func.func @transform_2(%arg0: i32) -> (i32, i32) {
    %c0_i32 = arith.constant 0 : i32
    %c0_i32_0 = arith.constant 0 : i32
    return %arg0, %c0_i32 : i32, i32
  }
  func.func @transform_3(%arg0: i32) -> (i32, i32) {
    %c0_i32 = arith.constant 0 : i32
    %c0_i32_0 = arith.constant 0 : i32
    return %arg0, %c0_i32 : i32, i32
  }
  func.func @transform_4(%arg0: i32) -> (i32, i32) {
    %c0_i32 = arith.constant 0 : i32
    %c0_i32_0 = arith.constant 0 : i32
    %c0_i32_1 = arith.constant 0 : i32
    return %c0_i32, %c0_i32_0 : i32, i32
  }
  func.func @transform_5(%arg0: i32) -> (i32, i32) {
    %c0_i32 = arith.constant 0 : i32
    %c0_i32_0 = arith.constant 0 : i32
    %c0_i32_1 = arith.constant 0 : i32
    return %c0_i32, %c0_i32_0 : i32, i32
  }
  func.func @transform_6(%arg0: i32) -> (i32, i32) {
    %c0_i32 = arith.constant 0 : i32
    %c0_i32_0 = arith.constant 0 : i32
    %c0_i32_1 = arith.constant 0 : i32
    return %c0_i32, %c0_i32_0 : i32, i32
  }
  func.func @transform_7(%arg0: i32) -> (i32, i32) {
    %c0_i32 = arith.constant 0 : i32
    %c0_i32_0 = arith.constant 0 : i32
    %c0_i32_1 = arith.constant 0 : i32
    return %c0_i32, %c0_i32_0 : i32, i32
  }
  func.func @transform_8(%arg0: i32) -> (i32, i32) {
    %c0_i32 = arith.constant 0 : i32
    %c0_i32_0 = arith.constant 0 : i32
    %c0_i32_1 = arith.constant 0 : i32
    return %c0_i32, %c0_i32_0 : i32, i32
  }
  func.func @transform_9(%arg0: i32) -> (i32, i32) {
    %c0_i32 = arith.constant 0 : i32
    %c0_i32_0 = arith.constant 0 : i32
    %c0_i32_1 = arith.constant 0 : i32
    return %c0_i32, %c0_i32_0 : i32, i32
  }
  func.func @transform_10(%arg0: i32) -> (i32, i32) {
    %c0_i32 = arith.constant 0 : i32
    %c0_i32_0 = arith.constant 0 : i32
    %c0_i32_1 = arith.constant 0 : i32
    return %c0_i32, %c0_i32_0 : i32, i32
  }
  func.func @transform_11(%arg0: i32) -> (i32, i32) {
    %c0_i32 = arith.constant 0 : i32
    %c0_i32_0 = arith.constant 0 : i32
    %c0_i32_1 = arith.constant 0 : i32
    return %c0_i32, %c0_i32_0 : i32, i32
  }
  func.func @transform_12(%arg0: i32) -> (i32, i32) {
    %c0_i32 = arith.constant 0 : i32
    %c0_i32_0 = arith.constant 0 : i32
    %c0_i32_1 = arith.constant 0 : i32
    return %c0_i32, %c0_i32_0 : i32, i32
  }
  func.func @transform_13(%arg0: i32) -> (i32, i32) {
    %c0_i32 = arith.constant 0 : i32
    %c0_i32_0 = arith.constant 0 : i32
    %c0_i32_1 = arith.constant 0 : i32
    return %c0_i32, %c0_i32_0 : i32, i32
  }
  func.func @transform_14(%arg0: i32) -> (i32, i32) {
    %c0_i32 = arith.constant 0 : i32
    %c0_i32_0 = arith.constant 0 : i32
    %c0_i32_1 = arith.constant 0 : i32
    return %c0_i32, %c0_i32_0 : i32, i32
  }
  func.func @transform_15(%arg0: i32) -> (i32, i32) {
    %c0_i32 = arith.constant 0 : i32
    %c0_i32_0 = arith.constant 0 : i32
    %c0_i32_1 = arith.constant 0 : i32
    return %c0_i32, %c0_i32_0 : i32, i32
  }
  func.func @transform_16(%arg0: i32) -> (i32, i32) {
    %c0_i32 = arith.constant 0 : i32
    %c0_i32_0 = arith.constant 0 : i32
    %c0_i32_1 = arith.constant 0 : i32
    return %c0_i32, %c0_i32_0 : i32, i32
  }
  func.func @transform_17(%arg0: i32) -> (i32, i32) {
    %c0_i32 = arith.constant 0 : i32
    %c0_i32_0 = arith.constant 0 : i32
    %c0_i32_1 = arith.constant 0 : i32
    return %c0_i32, %c0_i32_0 : i32, i32
  }
  func.func @transform_18(%arg0: i32) -> (i32, i32) {
    %c0_i32 = arith.constant 0 : i32
    %c0_i32_0 = arith.constant 0 : i32
    %c0_i32_1 = arith.constant 0 : i32
    return %c0_i32, %c0_i32_0 : i32, i32
  }
  func.func @transform_19(%arg0: i32) -> (i32, i32) {
    %c0_i32 = arith.constant 0 : i32
    %c0_i32_0 = arith.constant 0 : i32
    %c0_i32_1 = arith.constant 0 : i32
    return %c0_i32, %c0_i32_0 : i32, i32
  }
  func.func @transform_20(%arg0: i32) -> (i32, i32) {
    %c0_i32 = arith.constant 0 : i32
    %c0_i32_0 = arith.constant 0 : i32
    return %arg0, %c0_i32 : i32, i32
  }
  func.func @transform_21(%arg0: i32) -> (i32, i32) {
    %c0_i32 = arith.constant 0 : i32
    %c0_i32_0 = arith.constant 0 : i32
    return %arg0, %c0_i32 : i32, i32
  }
  func.func @transform_22(%arg0: i32) -> (i32, i32) {
    %c0_i32 = arith.constant 0 : i32
    %c0_i32_0 = arith.constant 0 : i32
    return %arg0, %c0_i32 : i32, i32
  }
}

module attributes {stable_mosaic.version = 11 : i64} {
  func.func @_vae_kernel(%arg0: i32, %arg1: memref<1x1xf32, #tpu.memory_space<smem>>, %arg2: memref<8x16xf32, #tpu.memory_space<vmem>>, %arg3: memref<8x8xf32, #tpu.memory_space<vmem>>, %arg4: memref<8x16xf32, #tpu.memory_space<vmem>>, %arg5: memref<16x32xf32, #tpu.memory_space<vmem>>, %arg6: memref<8x32xf32, #tpu.memory_space<vmem>>, %arg7: memref<1x32xf32, #tpu.memory_space<vmem>>, %arg8: memref<32x32xf32, #tpu.memory_space<vmem>>, %arg9: memref<1x32xf32, #tpu.memory_space<vmem>>, %arg10: memref<32x16xf32, #tpu.memory_space<vmem>>, %arg11: memref<1x16xf32, #tpu.memory_space<vmem>>, %arg12: memref<32x16xf32, #tpu.memory_space<vmem>>, %arg13: memref<1x16xf32, #tpu.memory_space<vmem>>, %arg14: memref<16x32xf32, #tpu.memory_space<vmem>>, %arg15: memref<16x32xf32, #tpu.memory_space<vmem>>, %arg16: memref<1x32xf32, #tpu.memory_space<vmem>>, %arg17: memref<32x32xf32, #tpu.memory_space<vmem>>, %arg18: memref<1x32xf32, #tpu.memory_space<vmem>>, %arg19: memref<32x8xf32, #tpu.memory_space<vmem>>, %arg20: memref<1x8xf32, #tpu.memory_space<vmem>>, %arg21: memref<8x8xf32, #tpu.memory_space<vmem>>, %arg22: memref<8x16xf32, #tpu.memory_space<vmem>>, %arg23: memref<8x16xf32, #tpu.memory_space<vmem>>) attributes {dimension_semantics = [#tpu.dimension_semantics<parallel>], iteration_bounds = array<i64: 2>, scalar_prefetch = 0 : i64, scratch_operands = 0 : i64, tpu.core_type = #tpu.core_type<tc>, window_params = [{transform_indices = @transform_0, window_bounds = array<i64: 1, 1>}, {transform_indices = @transform_1, window_bounds = array<i64: 8, 16>}, {transform_indices = @transform_2, window_bounds = array<i64: 8, 8>}, {transform_indices = @transform_3, window_bounds = array<i64: 8, 16>}, {pipeline_mode = #tpu.pipeline_mode<synchronous>, transform_indices = @transform_4, window_bounds = array<i64: 16, 32>}, {pipeline_mode = #tpu.pipeline_mode<synchronous>, transform_indices = @transform_5, window_bounds = array<i64: 8, 32>}, {pipeline_mode = #tpu.pipeline_mode<synchronous>, transform_indices = @transform_6, window_bounds = array<i64: 1, 32>}, {pipeline_mode = #tpu.pipeline_mode<synchronous>, transform_indices = @transform_7, window_bounds = array<i64: 32, 32>}, {pipeline_mode = #tpu.pipeline_mode<synchronous>, transform_indices = @transform_8, window_bounds = array<i64: 1, 32>}, {pipeline_mode = #tpu.pipeline_mode<synchronous>, transform_indices = @transform_9, window_bounds = array<i64: 32, 16>}, {pipeline_mode = #tpu.pipeline_mode<synchronous>, transform_indices = @transform_10, window_bounds = array<i64: 1, 16>}, {pipeline_mode = #tpu.pipeline_mode<synchronous>, transform_indices = @transform_11, window_bounds = array<i64: 32, 16>}, {pipeline_mode = #tpu.pipeline_mode<synchronous>, transform_indices = @transform_12, window_bounds = array<i64: 1, 16>}, {pipeline_mode = #tpu.pipeline_mode<synchronous>, transform_indices = @transform_13, window_bounds = array<i64: 16, 32>}, {pipeline_mode = #tpu.pipeline_mode<synchronous>, transform_indices = @transform_14, window_bounds = array<i64: 16, 32>}, {pipeline_mode = #tpu.pipeline_mode<synchronous>, transform_indices = @transform_15, window_bounds = array<i64: 1, 32>}, {pipeline_mode = #tpu.pipeline_mode<synchronous>, transform_indices = @transform_16, window_bounds = array<i64: 32, 32>}, {pipeline_mode = #tpu.pipeline_mode<synchronous>, transform_indices = @transform_17, window_bounds = array<i64: 1, 32>}, {pipeline_mode = #tpu.pipeline_mode<synchronous>, transform_indices = @transform_18, window_bounds = array<i64: 32, 8>}, {pipeline_mode = #tpu.pipeline_mode<synchronous>, transform_indices = @transform_19, window_bounds = array<i64: 1, 8>}, {transform_indices = @transform_20, window_bounds = array<i64: 8, 8>}, {transform_indices = @transform_21, window_bounds = array<i64: 8, 16>}, {transform_indices = @transform_22, window_bounds = array<i64: 8, 16>}]} {
    %c0 = arith.constant 0 : index
    %c0_0 = arith.constant 0 : index
    %0 = vector.load %arg2[%c0, %c0_0] : memref<8x16xf32, #tpu.memory_space<vmem>>, vector<8x16xf32>
    %c0_1 = arith.constant 0 : index
    %c0_2 = arith.constant 0 : index
    %1 = vector.load %arg3[%c0_1, %c0_2] : memref<8x8xf32, #tpu.memory_space<vmem>>, vector<8x8xf32>
    %c0_3 = arith.constant 0 : index
    %c0_4 = arith.constant 0 : index
    %2 = vector.load %arg4[%c0_3, %c0_4] : memref<8x16xf32, #tpu.memory_space<vmem>>, vector<8x16xf32>
    %c0_5 = arith.constant 0 : index
    %c0_6 = arith.constant 0 : index
    %3 = vector.load %arg5[%c0_5, %c0_6] : memref<16x32xf32, #tpu.memory_space<vmem>>, vector<16x32xf32>
    %cst = arith.constant dense<0.000000e+00> : vector<8x32xf32>
    %4 = tpu.matmul %0, %3, %cst {dimension_numbers = #tpu.dot_dimension_numbers<[1], [0], [0], [1], [0, 0, 1, 1], [], []>} : vector<8x16xf32>, vector<16x32xf32>, vector<8x32xf32> -> vector<8x32xf32>
    %c0_7 = arith.constant 0 : index
    %c0_8 = arith.constant 0 : index
    %5 = vector.load %arg6[%c0_7, %c0_8] : memref<8x32xf32, #tpu.memory_space<vmem>>, vector<8x32xf32>
    %cst_9 = arith.constant dense<0.000000e+00> : vector<8x32xf32>
    %6 = tpu.matmul %1, %5, %cst_9 {dimension_numbers = #tpu.dot_dimension_numbers<[1], [0], [0], [1], [0, 0, 1, 1], [], []>} : vector<8x8xf32>, vector<8x32xf32>, vector<8x32xf32> -> vector<8x32xf32>
    %7 = arith.addf %4, %6 : vector<8x32xf32>
    %c0_10 = arith.constant 0 : index
    %c0_11 = arith.constant 0 : index
    %8 = vector.load %arg7[%c0_10, %c0_11] : memref<1x32xf32, #tpu.memory_space<vmem>>, vector<1x32xf32>
    %9 = vector.broadcast %8 : vector<1x32xf32> to vector<8x32xf32>
    %10 = arith.addf %7, %9 : vector<8x32xf32>
    %cst_12 = arith.constant 0.000000e+00 : f32
    %11 = vector.broadcast %cst_12 : f32 to vector<8x32xf32>
    %12 = arith.maximumf %10, %11 : vector<8x32xf32>
    %c0_13 = arith.constant 0 : index
    %c0_14 = arith.constant 0 : index
    %13 = vector.load %arg8[%c0_13, %c0_14] : memref<32x32xf32, #tpu.memory_space<vmem>>, vector<32x32xf32>
    %cst_15 = arith.constant dense<0.000000e+00> : vector<8x32xf32>
    %14 = tpu.matmul %12, %13, %cst_15 {dimension_numbers = #tpu.dot_dimension_numbers<[1], [0], [0], [1], [0, 0, 1, 1], [], []>} : vector<8x32xf32>, vector<32x32xf32>, vector<8x32xf32> -> vector<8x32xf32>
    %c0_16 = arith.constant 0 : index
    %c0_17 = arith.constant 0 : index
    %15 = vector.load %arg9[%c0_16, %c0_17] : memref<1x32xf32, #tpu.memory_space<vmem>>, vector<1x32xf32>
    %16 = vector.broadcast %15 : vector<1x32xf32> to vector<8x32xf32>
    %17 = arith.addf %14, %16 : vector<8x32xf32>
    %cst_18 = arith.constant 0.000000e+00 : f32
    %18 = vector.broadcast %cst_18 : f32 to vector<8x32xf32>
    %19 = arith.maximumf %17, %18 : vector<8x32xf32>
    %c0_19 = arith.constant 0 : index
    %c0_20 = arith.constant 0 : index
    %20 = vector.load %arg10[%c0_19, %c0_20] : memref<32x16xf32, #tpu.memory_space<vmem>>, vector<32x16xf32>
    %cst_21 = arith.constant dense<0.000000e+00> : vector<8x16xf32>
    %21 = tpu.matmul %19, %20, %cst_21 {dimension_numbers = #tpu.dot_dimension_numbers<[1], [0], [0], [1], [0, 0, 1, 1], [], []>} : vector<8x32xf32>, vector<32x16xf32>, vector<8x16xf32> -> vector<8x16xf32>
    %c0_22 = arith.constant 0 : index
    %c0_23 = arith.constant 0 : index
    %22 = vector.load %arg11[%c0_22, %c0_23] : memref<1x16xf32, #tpu.memory_space<vmem>>, vector<1x16xf32>
    %23 = vector.broadcast %22 : vector<1x16xf32> to vector<8x16xf32>
    %24 = arith.addf %21, %23 : vector<8x16xf32>
    %c0_24 = arith.constant 0 : index
    %c0_25 = arith.constant 0 : index
    %25 = vector.load %arg12[%c0_24, %c0_25] : memref<32x16xf32, #tpu.memory_space<vmem>>, vector<32x16xf32>
    %cst_26 = arith.constant dense<0.000000e+00> : vector<8x16xf32>
    %26 = tpu.matmul %19, %25, %cst_26 {dimension_numbers = #tpu.dot_dimension_numbers<[1], [0], [0], [1], [0, 0, 1, 1], [], []>} : vector<8x32xf32>, vector<32x16xf32>, vector<8x16xf32> -> vector<8x16xf32>
    %c0_27 = arith.constant 0 : index
    %c0_28 = arith.constant 0 : index
    %27 = vector.load %arg13[%c0_27, %c0_28] : memref<1x16xf32, #tpu.memory_space<vmem>>, vector<1x16xf32>
    %28 = vector.broadcast %27 : vector<1x16xf32> to vector<8x16xf32>
    %29 = arith.addf %26, %28 : vector<8x16xf32>
    %cst_29 = arith.constant -4.000000e+00 : f32
    %cst_30 = arith.constant 1.500000e+01 : f32
    %30 = vector.broadcast %cst_29 : f32 to vector<8x16xf32>
    %31 = arith.maximumf %30, %29 : vector<8x16xf32>
    %32 = vector.broadcast %cst_30 : f32 to vector<8x16xf32>
    %33 = arith.minimumf %32, %31 : vector<8x16xf32>
    %34 = math.exp %33 : vector<8x16xf32>
    %35 = arith.mulf %34, %2 : vector<8x16xf32>
    %36 = arith.addf %24, %35 : vector<8x16xf32>
    %c0_31 = arith.constant 0 : index
    %c0_32 = arith.constant 0 : index
    %37 = vector.load %arg14[%c0_31, %c0_32] : memref<16x32xf32, #tpu.memory_space<vmem>>, vector<16x32xf32>
    %cst_33 = arith.constant dense<0.000000e+00> : vector<8x32xf32>
    %38 = tpu.matmul %0, %37, %cst_33 {dimension_numbers = #tpu.dot_dimension_numbers<[1], [0], [0], [1], [0, 0, 1, 1], [], []>} : vector<8x16xf32>, vector<16x32xf32>, vector<8x32xf32> -> vector<8x32xf32>
    %c0_34 = arith.constant 0 : index
    %c0_35 = arith.constant 0 : index
    %39 = vector.load %arg15[%c0_34, %c0_35] : memref<16x32xf32, #tpu.memory_space<vmem>>, vector<16x32xf32>
    %cst_36 = arith.constant dense<0.000000e+00> : vector<8x32xf32>
    %40 = tpu.matmul %36, %39, %cst_36 {dimension_numbers = #tpu.dot_dimension_numbers<[1], [0], [0], [1], [0, 0, 1, 1], [], []>} : vector<8x16xf32>, vector<16x32xf32>, vector<8x32xf32> -> vector<8x32xf32>
    %41 = arith.addf %38, %40 : vector<8x32xf32>
    %c0_37 = arith.constant 0 : index
    %c0_38 = arith.constant 0 : index
    %42 = vector.load %arg16[%c0_37, %c0_38] : memref<1x32xf32, #tpu.memory_space<vmem>>, vector<1x32xf32>
    %43 = vector.broadcast %42 : vector<1x32xf32> to vector<8x32xf32>
    %44 = arith.addf %41, %43 : vector<8x32xf32>
    %cst_39 = arith.constant 0.000000e+00 : f32
    %45 = vector.broadcast %cst_39 : f32 to vector<8x32xf32>
    %46 = arith.maximumf %44, %45 : vector<8x32xf32>
    %c0_40 = arith.constant 0 : index
    %c0_41 = arith.constant 0 : index
    %47 = vector.load %arg17[%c0_40, %c0_41] : memref<32x32xf32, #tpu.memory_space<vmem>>, vector<32x32xf32>
    %cst_42 = arith.constant dense<0.000000e+00> : vector<8x32xf32>
    %48 = tpu.matmul %46, %47, %cst_42 {dimension_numbers = #tpu.dot_dimension_numbers<[1], [0], [0], [1], [0, 0, 1, 1], [], []>} : vector<8x32xf32>, vector<32x32xf32>, vector<8x32xf32> -> vector<8x32xf32>
    %c0_43 = arith.constant 0 : index
    %c0_44 = arith.constant 0 : index
    %49 = vector.load %arg18[%c0_43, %c0_44] : memref<1x32xf32, #tpu.memory_space<vmem>>, vector<1x32xf32>
    %50 = vector.broadcast %49 : vector<1x32xf32> to vector<8x32xf32>
    %51 = arith.addf %48, %50 : vector<8x32xf32>
    %cst_45 = arith.constant 0.000000e+00 : f32
    %52 = vector.broadcast %cst_45 : f32 to vector<8x32xf32>
    %53 = arith.maximumf %51, %52 : vector<8x32xf32>
    %c0_46 = arith.constant 0 : index
    %c0_47 = arith.constant 0 : index
    %54 = vector.load %arg19[%c0_46, %c0_47] : memref<32x8xf32, #tpu.memory_space<vmem>>, vector<32x8xf32>
    %cst_48 = arith.constant dense<0.000000e+00> : vector<8x8xf32>
    %55 = tpu.matmul %53, %54, %cst_48 {dimension_numbers = #tpu.dot_dimension_numbers<[1], [0], [0], [1], [0, 0, 1, 1], [], []>} : vector<8x32xf32>, vector<32x8xf32>, vector<8x8xf32> -> vector<8x8xf32>
    %c0_49 = arith.constant 0 : index
    %c0_50 = arith.constant 0 : index
    %56 = vector.load %arg20[%c0_49, %c0_50] : memref<1x8xf32, #tpu.memory_space<vmem>>, vector<1x8xf32>
    %57 = vector.broadcast %56 : vector<1x8xf32> to vector<8x8xf32>
    %58 = arith.addf %55, %57 : vector<8x8xf32>
    %c0_51 = arith.constant 0 : index
    %c0_52 = arith.constant 0 : index
    %59 = memref.load %arg1[%c0_51, %c0_52] : memref<1x1xf32, #tpu.memory_space<smem>>
    %60 = math.tanh %58 : vector<8x8xf32>
    %61 = vector.broadcast %59 : f32 to vector<8x8xf32>
    %62 = arith.mulf %61, %60 : vector<8x8xf32>
    %c0_53 = arith.constant 0 : index
    %c0_54 = arith.constant 0 : index
    %63 = vector.load %arg21[%c0_53, %c0_54] : memref<8x8xf32, #tpu.memory_space<vmem>>, vector<8x8xf32>
    tpu.vector_store %arg21[%c0_53, %c0_54], %62 {strides = array<i32>} : memref<8x8xf32, #tpu.memory_space<vmem>>, vector<8x8xf32>,
    %c0_55 = arith.constant 0 : index
    %c0_56 = arith.constant 0 : index
    %64 = vector.load %arg22[%c0_55, %c0_56] : memref<8x16xf32, #tpu.memory_space<vmem>>, vector<8x16xf32>
    tpu.vector_store %arg22[%c0_55, %c0_56], %24 {strides = array<i32>} : memref<8x16xf32, #tpu.memory_space<vmem>>, vector<8x16xf32>,
    %c0_57 = arith.constant 0 : index
    %c0_58 = arith.constant 0 : index
    %65 = vector.load %arg23[%c0_57, %c0_58] : memref<8x16xf32, #tpu.memory_space<vmem>>, vector<8x16xf32>
    tpu.vector_store %arg23[%c0_57, %c0_58], %34 {strides = array<i32>} : memref<8x16xf32, #tpu.memory_space<vmem>>, vector<8x16xf32>,
    return
  }
  func.func @transform_0(%arg0: i32) -> (i32, i32) {
    %c0_i32 = arith.constant 0 : i32
    %c0_i32_0 = arith.constant 0 : i32
    %c0_i32_1 = arith.constant 0 : i32
    return %c0_i32, %c0_i32_0 : i32, i32
  }
  func.func @transform_1(%arg0: i32) -> (i32, i32) {
    %c0_i32 = arith.constant 0 : i32
    %c0_i32_0 = arith.constant 0 : i32
    return %arg0, %c0_i32 : i32, i32
  }
  func.func @transform_2(%arg0: i32) -> (i32, i32) {
    %c0_i32 = arith.constant 0 : i32
    %c0_i32_0 = arith.constant 0 : i32
    return %arg0, %c0_i32 : i32, i32
  }
  func.func @transform_3(%arg0: i32) -> (i32, i32) {
    %c0_i32 = arith.constant 0 : i32
    %c0_i32_0 = arith.constant 0 : i32
    return %arg0, %c0_i32 : i32, i32
  }
  func.func @transform_4(%arg0: i32) -> (i32, i32) {
    %c0_i32 = arith.constant 0 : i32
    %c0_i32_0 = arith.constant 0 : i32
    %c0_i32_1 = arith.constant 0 : i32
    return %c0_i32, %c0_i32_0 : i32, i32
  }
  func.func @transform_5(%arg0: i32) -> (i32, i32) {
    %c0_i32 = arith.constant 0 : i32
    %c0_i32_0 = arith.constant 0 : i32
    %c0_i32_1 = arith.constant 0 : i32
    return %c0_i32, %c0_i32_0 : i32, i32
  }
  func.func @transform_6(%arg0: i32) -> (i32, i32) {
    %c0_i32 = arith.constant 0 : i32
    %c0_i32_0 = arith.constant 0 : i32
    %c0_i32_1 = arith.constant 0 : i32
    return %c0_i32, %c0_i32_0 : i32, i32
  }
  func.func @transform_7(%arg0: i32) -> (i32, i32) {
    %c0_i32 = arith.constant 0 : i32
    %c0_i32_0 = arith.constant 0 : i32
    %c0_i32_1 = arith.constant 0 : i32
    return %c0_i32, %c0_i32_0 : i32, i32
  }
  func.func @transform_8(%arg0: i32) -> (i32, i32) {
    %c0_i32 = arith.constant 0 : i32
    %c0_i32_0 = arith.constant 0 : i32
    %c0_i32_1 = arith.constant 0 : i32
    return %c0_i32, %c0_i32_0 : i32, i32
  }
  func.func @transform_9(%arg0: i32) -> (i32, i32) {
    %c0_i32 = arith.constant 0 : i32
    %c0_i32_0 = arith.constant 0 : i32
    %c0_i32_1 = arith.constant 0 : i32
    return %c0_i32, %c0_i32_0 : i32, i32
  }
  func.func @transform_10(%arg0: i32) -> (i32, i32) {
    %c0_i32 = arith.constant 0 : i32
    %c0_i32_0 = arith.constant 0 : i32
    %c0_i32_1 = arith.constant 0 : i32
    return %c0_i32, %c0_i32_0 : i32, i32
  }
  func.func @transform_11(%arg0: i32) -> (i32, i32) {
    %c0_i32 = arith.constant 0 : i32
    %c0_i32_0 = arith.constant 0 : i32
    %c0_i32_1 = arith.constant 0 : i32
    return %c0_i32, %c0_i32_0 : i32, i32
  }
  func.func @transform_12(%arg0: i32) -> (i32, i32) {
    %c0_i32 = arith.constant 0 : i32
    %c0_i32_0 = arith.constant 0 : i32
    %c0_i32_1 = arith.constant 0 : i32
    return %c0_i32, %c0_i32_0 : i32, i32
  }
  func.func @transform_13(%arg0: i32) -> (i32, i32) {
    %c0_i32 = arith.constant 0 : i32
    %c0_i32_0 = arith.constant 0 : i32
    %c0_i32_1 = arith.constant 0 : i32
    return %c0_i32, %c0_i32_0 : i32, i32
  }
  func.func @transform_14(%arg0: i32) -> (i32, i32) {
    %c0_i32 = arith.constant 0 : i32
    %c0_i32_0 = arith.constant 0 : i32
    %c0_i32_1 = arith.constant 0 : i32
    return %c0_i32, %c0_i32_0 : i32, i32
  }
  func.func @transform_15(%arg0: i32) -> (i32, i32) {
    %c0_i32 = arith.constant 0 : i32
    %c0_i32_0 = arith.constant 0 : i32
    %c0_i32_1 = arith.constant 0 : i32
    return %c0_i32, %c0_i32_0 : i32, i32
  }
  func.func @transform_16(%arg0: i32) -> (i32, i32) {
    %c0_i32 = arith.constant 0 : i32
    %c0_i32_0 = arith.constant 0 : i32
    %c0_i32_1 = arith.constant 0 : i32
    return %c0_i32, %c0_i32_0 : i32, i32
  }
  func.func @transform_17(%arg0: i32) -> (i32, i32) {
    %c0_i32 = arith.constant 0 : i32
    %c0_i32_0 = arith.constant 0 : i32
    %c0_i32_1 = arith.constant 0 : i32
    return %c0_i32, %c0_i32_0 : i32, i32
  }
  func.func @transform_18(%arg0: i32) -> (i32, i32) {
    %c0_i32 = arith.constant 0 : i32
    %c0_i32_0 = arith.constant 0 : i32
    %c0_i32_1 = arith.constant 0 : i32
    return %c0_i32, %c0_i32_0 : i32, i32
  }
  func.func @transform_19(%arg0: i32) -> (i32, i32) {
    %c0_i32 = arith.constant 0 : i32
    %c0_i32_0 = arith.constant 0 : i32
    %c0_i32_1 = arith.constant 0 : i32
    return %c0_i32, %c0_i32_0 : i32, i32
  }
  func.func @transform_20(%arg0: i32) -> (i32, i32) {
    %c0_i32 = arith.constant 0 : i32
    %c0_i32_0 = arith.constant 0 : i32
    return %arg0, %c0_i32 : i32, i32
  }
  func.func @transform_21(%arg0: i32) -> (i32, i32) {
    %c0_i32 = arith.constant 0 : i32
    %c0_i32_0 = arith.constant 0 : i32
    return %arg0, %c0_i32 : i32, i32
  }
  func.func @transform_22(%arg0: i32) -> (i32, i32) {
    %c0_i32 = arith.constant 0 : i32
    %c0_i32_0 = arith.constant 0 : i32
    return %arg0, %c0_i32 : i32, i32
  }
}

</mosaic_0001>

<bundles_post_ra>
// kernel: tpu_custom_call.1
= control target key start
LH: loop header
LB: loop body
LE: loop exit
PB: predicated region body
PF: predicated region fallthrough
CT: control target
= control target key end

     0   :  { %s2524_s0 = inlined_call_operand.<no memory space> [shape: f32[1,1], index: 0, kind: input, shape index: {}]   ;;  %s2525_s1 = inlined_call_operand.vmem [shape: f32[16,16], index: 1, kind: input, shape index: {}]   ;;  %s2526_s2 = inlined_call_operand.vmem [shape: f32[16,8], index: 2, kind: input, shape index: {}]   ;;  %s2527_s3 = inlined_call_operand.vmem [shape: f32[16,16], index: 3, kind: input, shape index: {}]   ;;  %s2528_s4 = inlined_call_operand.vmem [shape: f32[16,32], index: 4, kind: input, shape index: {}]   ;;  %s2529_s5 = inlined_call_operand.hbm [shape: f32[8,32], index: 5, kind: input, shape index: {}]   ;;  %s2530_s6 = inlined_call_operand.vmem [shape: f32[1,32], index: 6, kind: input, shape index: {}]   ;;  %s2531_s7 = inlined_call_operand.vmem [shape: f32[32,32], index: 7, kind: input, shape index: {}]   ;;  %s2532_s8 = inlined_call_operand.vmem [shape: f32[1,32], index: 8, kind: input, shape index: {}]   ;;  %s2533_s9 = inlined_call_operand.vmem [shape: f32[32,16], index: 9, kind: input, shape index: {}]   ;;  %s2534_s10 = inlined_call_operand.vmem [shape: f32[1,16], index: 10, kind: input, shape index: {}]   ;;  %s2535_s11 = inlined_call_operand.vmem [shape: f32[32,16], index: 11, kind: input, shape index: {}]   ;;  %s2536_s12 = inlined_call_operand.vmem [shape: f32[1,16], index: 12, kind: input, shape index: {}]   ;;  %s2537_s13 = inlined_call_operand.vmem [shape: f32[16,32], index: 13, kind: input, shape index: {}]   ;;  %s2538_s14 = inlined_call_operand.vmem [shape: f32[16,32], index: 14, kind: input, shape index: {}]   ;;  %s2539_s15 = inlined_call_operand.vmem [shape: f32[1,32], index: 15, kind: input, shape index: {}]   ;;  %s2540_s16 = inlined_call_operand.vmem [shape: f32[32,32], index: 16, kind: input, shape index: {}]   ;;  %s2541_s17 = inlined_call_operand.vmem [shape: f32[1,32], index: 17, kind: input, shape index: {}]   ;;  %s2542_s18 = inlined_call_operand.vmem [shape: f32[32,8], index: 18, kind: input, shape index: {}]   ;;  %s2543_s19 = inlined_call_operand.vmem [shape: f32[1,8], index: 19, kind: input, shape index: {}]   ;;  %s2544_s20 = inlined_call_operand.vmem [shape: f32[16,8], index: 20, kind: output, shape index: {0}]   ;;  %s2545_s21 = inlined_call_operand.hbm [shape: f32[16,16], index: 21, kind: output, shape index: {1}]   ;;  %s2546_s22 = inlined_call_operand.hbm [shape: f32[16,16], index: 22, kind: output, shape index: {2}]  }
   0x1   :  { %2560 = sst [smem:[#allocation18_spill]] %s2524_s0 }
   0x2   :  { %2561 = sst [smem:[#allocation19_spill]] %s2525_s1  ;;  %s2572_s29 = sld [smem:[#allocation18_spill]] }
   0x3   :  { %2562 = sst [smem:[#allocation20_spill]] %s2526_s2 }
   0x4   :  { %2563 = sst [smem:[#allocation21_spill]] %s2527_s3 }
   0x5   :  { %2564 = sst [smem:[#allocation22_spill]] %s2528_s4 }
   0x6   :  { %2565 = sst [smem:[#allocation23_spill]] %s2529_s5 }
   0x7   :  { %2566 = sst [smem:[#allocation24_spill]] %s2530_s6 }
   0x8   :  { %2567 = sst [smem:[#allocation25_spill]] %s2531_s7 }
   0x9   :  { %2568 = sst [smem:[#allocation26_spill]] %s2532_s8 }
   0xa   :  { %2569 = sst [smem:[#allocation27_spill]] %s2533_s9 }
   0xb   :  { %2570 = sst [smem:[#allocation28_spill]] %s2543_s19 }
   0xc   :  { %2571 = sst [smem:[#allocation29_spill]] %s2544_s20 }
   0xd   :  { %28 = sst [smem:[#allocation2]] %s2572_s29 }
   0xe   :  { %29 = vsyncpa [#allocation4], 0 }
   0xf   :  { %30 = vsyncpa [#allocation5], 0 }
  0x10   :  { %32 = vsyncpa [#allocation5 + $0x1], 0 }
  0x11   :  { %33 = vsyncpa [#allocation8], 0 }
  0x12   :  { %35 = vsyncpa [#allocation8 + $0x1], 0  ;;  %s2194_s30 = smov 0   ;;  %s2196_s4 = smov 0  }
  0x13   :  { %s2198_s0 = smov 0   ;;  %s2200_s23 = smov 0  }
  0x14 LB: > { %2573 = sst [smem:[#allocation12_spill]] %s2056_s30  ;;  %s2215_s1 = sadd.s32 4294967295, %s2068_s23   ;;  %s2068_s23 = sphi %s2200_s23, %s2603_s23   ;;  %s2064_s0 = sphi %s2198_s0, %s2608_s0   ;;  %s2060_s4 = sphi %s2196_s4, %s2607_s4   ;;  %s2056_s30 = sphi %s2194_s30, %s2606_s30  }
  0x15   : > { %2574 = sst [smem:[#allocation13_spill]] %s2064_s0  ;;  %s1690_s5 = sadd.s32 4294967294, %s2068_s23  }
  0x16   : > { %2575 = sst [smem:[#allocation14_spill]] %s2068_s23  ;;  %s2219_s24 = sadd.s32 1, %s2068_s23  }
  0x17   : > { %2576 = sst [smem:[#allocation15_spill]] %s2219_s24  ;;  %s509_s6 = sadd.s32 1, %s2064_s0 }
  0x18   : > { %s506_s25 = ssub.s32 %s2068_s23, %s2219_s24  ;;  %p519_p0 = scmp.ne.s32.totalorder %s2064_s0, %s2060_s4 }
  0x19   : > { %p507_p1 = scmp.eq.s32.totalorder %s506_s25, 0  ;;  %p520_p2 = scmp.eq.s32.totalorder %s2215_s1, 1 }
  0x1a   : > { %p525_p3 = scmp.ne.s32.totalorder %s2060_s4, %s2056_s30  ;;  %p526_p4 = scmp.eq.s32.totalorder %s1690_s5, 1 }
  0x1b   : > { %s2230_s26 = scalar_select %p507_p1, %s2064_s0, %s509_s6  }
  0x1c   : > { %p2232_p5 = por %p520_p2, %p519_p0  ;;  %p2236_p6 = por %p526_p4, %p525_p3 }
  0x1d   : > { %2577 = sst [smem:[#allocation16_spill]] %s2230_s26  ;;  %p1691_p7 = scmp.ge.s32.totalorder %s2068_s23, 1 }
  0x1e   : > { %s2578_s2 = scalar_select %p2232_p5, 1, 0 }
  0x1f   : > { %s2579_s27 = scalar_select %p2236_p6, 1, 0 }
  0x20   : > { %p559_p8 = scmp.lt.s32.totalorder %s2068_s23, 3  ;;  %p2555_p9 = scmp.eq.s32.totalorder %s2215_s1, 0 }
  0x21   : > { %2580 = sst [smem:[#allocation17_spill]] %s2579_s27  ;;  %s2070_s28 = smov [#allocation3]  }
  0x22   : > { %p2243_p10 = pnand %p1691_p7, %p559_p8  ;;  %s578_s29 = sshll.u32 %s2070_s28, 4  ;;  %s579_s29 = int_to_ptr.vmem [resolvable:$true] %s578_s29 }
  0x23   : > { %s2583_s26 = sld [smem:[#allocation23_spill]] }
  0x24   : > { %s2581_s3 = scalar_select %p2243_p10, 1, 0 }
  0x25   : > { %p1888_p11 = pneg %p2243_p10 }
  0x27   : > { %p2251_p12 = pnand %p2555_p9, %p1888_p11 }
  0x29   : > { %s1942_s0 = scalar_lea.hbm %s2583_s26, 128  ;;  %p1944_p0 = pneg %p2251_p12 }
  0x2a   : > { %p1943_p13 = scmp.ne.s32.totalorder %s2583_s26, %s1942_s0  ;;  %p1949_p3 = scmp.lt.u32.totalorder %s1942_s0, %s2583_s26 }
  0x2c   : > { %p1945_p1 = pnand %p1944_p0, %p1943_p13 }
  0x2e   : > { %p1946_p2 = pneg %p1945_p1 }
  0x30   : > { %p1951_p4 = pnand %p1949_p3, %p1946_p2 }
  0x32   : > { %1954 = shalt.err (!%p1951_p4)
}
  0x33   : > { %s1955_s23 = scalar_lea.vmem %s579_s29, 128  ;;  %p1963_p9 = scmp.lt.s32.totalorder %s579_s29, %s579_s29 }
  0x34   : > { %p1956_p7 = scmp.ne.s32.totalorder %s579_s29, %s1955_s23  ;;  %p1964_p6 = scmp.lt.s32.totalorder %s1955_s23, %s1955_s23 }
  0x36   : > { %p1958_p8 = pnand %p1956_p7, %p1944_p0  ;;  %p1965_p5 = por %p1964_p6, %p1963_p9 }
  0x38   : > { %p1959_p11 = pneg %p1958_p8 }
  0x3a   : > { %p1966_p10 = pnand %p1965_p5, %p1959_p11 }
  0x3c   : > { %1969 = shalt.err (!%p1966_p10)
}
  0x3d   : > { %1891 = dma.hbm_to_vmem [thread:$0]  (!%p2251_p12), %s2583_s26, 128, %s579_s29, [#allocation4]  }
  0x3e   : > { %p2584_p13 = scmp.ne.s32.totalorder %s2581_s3, 0 }
  0x3f   : > { %p2585_p1 = scmp.eq.s32.totalorder (!%p2584_p13), %s2215_s1, 0 }
  0x40   : > { %654 = sbr.rel (%p2584_p13) target bundleno = 1420 (0x58c), region = 100 }
  0x47   : > { %2043 = dma.done.wait (%p2585_p1), [#allocation4], 128   ;;  %p2586_p0 = pmov %p2585_p1 }
  0x48   : > { %p732_p6 = scmp.lt.s32.totalorder %s2215_s1, 1  ;;  %v2071_v0 = vmov 0.0|0.0   ;;  %v2072_v1 = vmov 0.0   ;;  %vm2073_vm0 = vmmov 0   ;;  %s2587_s29 = sld [smem:[#allocation20_spill]]  ;;  %vm754_vm1 = vcmask 64512  }
  0x49   : > { %2045 = vsyncadd (%p2586_p0), [#allocation4], 4294967168  ;;  %1841 = vmatprep.subr.bf16.mxu1 %v2071_v0  ;;  %1760 = vmatprep.subr.mxu0 %v2072_v1  ;;  %s2588_s28 = sld [smem:[#allocation22_spill]]  ;;  %v753_v4 = vld [vmem:[#allocation3] sm:$0xff]  ;;  %vm828_vm2 = vcmask 130048   ;;  %s2590_s7 = sld [smem:[#allocation25_spill]] }
  0x4a   : > { %1762 = vmatprep.mubr.msk.f32.mxu0 %vm2073_vm0, %v2072_v1  ;;  %s733_s30 = scalar_select %p732_p6, %s2215_s1, 1  ;;  %1769 = vmatprep.mubr.msk.f32.mxu1 %vm2073_vm0, %v2072_v1  ;;  %v1081_v23 = vld [vmem:[%s2535_s11] sm:$0xff]  ;;  %v1082_v24 = vld [vmem:[%s2535_s11 + $0x8] sm:$0xff]  ;;  %vm922_vm3 = vcmask 261120   ;;  %v1083_v30 = vld [vmem:[%s2535_s11 + $0x10] sm:$0xff] }
  0x4b   : > { %1761 = vmatpush3.msra.mxu0 %v753_v4  ;;  %s2591_s9 = sld [smem:[#allocation27_spill]]  ;;  %s2592_s23 = sld [smem:[#allocation24_spill]]  ;;  %v1857_v26 = vpack.c.bf16 %v1082_v24, %v1081_v23  ;;  %v1084_v32 = vld [vmem:[%s2535_s11 + $0x18] sm:$0xff]  ;;  %v1170_v39 = vld [vmem:[%s2538_s14] sm:$0xff]  ;;  %v1171_v40 = vld [vmem:[%s2538_s14 + $0x8] sm:$0xff] }
  0x4c   : > { %s2285_s0 = sshll.u32 %s733_s30, 3  ;;  %s2589_s30 = sld [smem:[#allocation19_spill]]  ;;  %1844 = vmatprep.subr.bf16.mxu0 %v2071_v0  ;;  %v1860_v33 = vpack.c.bf16 %v1084_v32, %v1083_v30  ;;  %v1863_v41 = vpack.c.bf16 %v1171_v40, %v1170_v39  ;;  %v1707_v42 = vld [vmem:[%s2534_s10] ss:$0 sm:$0xff]  ;;  %v1169_v55 = vld [vmem:[%s2537_s13 + $0x8] sm:$0xff]  ;;  %v1326_v63 = vld [vmem:[%s2540_s16 + $0x10] sm:$0xff] }
  0x4d   : > { %s2593_s8 = sld [smem:[#allocation26_spill]]  ;;  %s2377_s24 = sand.u32 1, %s2060_s4   ;;  %v1709_v43 = vld [vmem:[%s2536_s12] ss:$0 sm:$0xff]  ;;  %v1325_v61 = vld [vmem:[%s2540_s16 + $0x8] sm:$0xff] }
  0x4e   : > { %s739_s5 = scalar_lea.vmem %s2587_s29, %s2285_s0  ;;  %s1696_s27 = sshll.u32 %s2377_s24, 3  ;;  %v1168_v54 = vld [vmem:[%s2537_s13] sm:$0xff]  ;;  %v1410_v4 = vld [vmem:[%s2542_s18 + $0x8] sm:$0xff] }
  0x4f   : > { %v751_v2 = vld [vmem:[%s2588_s28] sm:$0xff]  ;;  %v752_v3 = vld [vmem:[%s2588_s28 + $0x8] sm:$0xff]  ;;  %v913_v11 = vld [vmem:[%s2590_s7 + $0x10] sm:$0xff]  ;;  %s2386_s3 = scalar_lea.vmem [#allocation6], %s1696_s27  ;;  %v1866_v58 = vpack.c.bf16 %v1169_v55, %v1168_v54  ;;  %s2559_s29 = sshll.u32 %s2215_s1, 7 }
  0x50   : > { %v1842_v5 = vpack.c.bf16 %v752_v3, %v751_v2  ;;  %v749_v6 = vld [vmem:[%s739_s5] sm:$0xff]  ;;  %v912_v9 = vld [vmem:[%s2590_s7 + $0x8] sm:$0xff]  ;;  %v914_v12 = vld [vmem:[%s2590_s7 + $0x18] sm:$0xff]  ;;  %s2594_s5 = sld [smem:[#allocation21_spill]]  ;;  %s1505_s20 = scalar_lea.sflag [#allocation5], %s2377_s24 }
  0x51   : > { %1763 = vmatmul.mubr.msk.f32.vlgmr.msra.gmra.mrb[0].mxu0 %vm754_vm1, %v749_v6  ;;  %v911_v8 = vld [vmem:[%s2590_s7] sm:$0xff]  ;;  %v1848_v13 = vpack.c.bf16 %v914_v12, %v913_v11  ;;  %v998_v15 = vld [vmem:[%s2591_s9 + $0x8] sm:$0xff]  ;;  %v999_v28 = vld [vmem:[%s2591_s9 + $0x10] sm:$0xff]  ;;  %p2595_p9 = scmp.ne.s32.totalorder %s2578_s2, 0 }
  0x52   : > { %s735_s19 = scalar_lea.vmem %s2589_s30, %s2285_s0  ;;  %1843 = vmatpush3.bf16.msra.mxu1 %v1842_v5  ;;  %1780 = vmatprep.mubr.msk.f32.mxu0 %vm2073_vm0, %v2072_v1  ;;  %v1845_v10 = vpack.c.bf16 %v912_v9, %v911_v8  ;;  %v997_v14 = vld [vmem:[%s2591_s9] sm:$0xff]  ;;  %v1000_v29 = vld [vmem:[%s2591_s9 + $0x18] sm:$0xff]  ;;  %s2453_s30 = scalar_lea.hbm %s2545_s21, %s2559_s29 }
  0x53   : > { %v2303_v7 = vld [vmem:[%s735_s19] sm:$0xff]  ;;  %1850 = vmatprep.subr.bf16.mxu1 %v2071_v0  ;;  %v1851_v16 = vpack.c.bf16 %v998_v15, %v997_v14  ;;  %v1854_v31 = vpack.c.bf16 %v1000_v29, %v999_v28  ;;  %v1412_v14 = vld [vmem:[%s2542_s18 + $0x18] sm:$0xff] }
  0x54   : > { %1846 = vmatpush3.bf16.msra.mxu0 %v1845_v10  ;;  %v1704_v20 = vld [vmem:[%s2592_s23] ss:$0 sm:$0xff]  ;;  %s2400_s23 = scalar_lea.vmem [#allocation7], %s1696_s27  ;;  %s2074_s27 = smov [#allocation6]  }
  0x55   : > { %1770 = vmatmul.mubr.msk.f32.vlgmr.msra.gmra.mrb[0].mxu1 %vm828_vm2, %v2303_v7  ;;  %1847 = vmatprep.subr.bf16.mxu0 %v2071_v0  ;;  %v1705_v34 = vld [vmem:[%s2593_s8] ss:$0 sm:$0xff]  ;;  %s1974_s19 = sshll.u32 %s2074_s27, 4  ;;  %s1975_s19 = int_to_ptr.vmem [resolvable:$false] %s1974_s19 }
  0x56   : > { %1791 = vmatprep.mubr.msk.f32.mxu1 %vm2073_vm0, %v2072_v1  ;;  %1852 = vmatpush3.bf16.msra.mxu1 %v1851_v16  ;;  %s743_s6 = scalar_lea.vmem %s2594_s5, %s2285_s0  ;;  %v1324_v60 = vld [vmem:[%s2540_s16] sm:$0xff]  ;;  %s1526_s5 = sshll.u32 %s2386_s3, 4  ;;  %s1527_s5 = int_to_ptr.vmem [resolvable:$true] %s1526_s5 }
  0x57   : > { %1853 = vmatprep.subr.bf16.mxu1 %v2071_v0  ;;  %v750_v53 = vld [vmem:[%s743_s6] sm:$0xff]  ;;  %v1869_v62 = vpack.c.bf16 %v1325_v61, %v1324_v60  ;;  %s1970_s26 = scalar_lea.vmem %s1527_s5, 128  ;;  %s1976_s7 = scalar_lea.vmem %s1975_s19, 256 }
  0x58   : > { %1849 = vmatpush3.bf16.msra.mxu0 %v1848_v13  ;;  %v1409_v3 = vld [vmem:[%s2542_s18] sm:$0xff]  ;;  %p1971_p5 = scmp.ne.s32.totalorder %s1527_s5, %s1970_s26  ;;  %p1977_p2 = scmp.lt.s32.totalorder %s1527_s5, %s1975_s19 }
  0x59   : > { %1856 = vmatprep.subr.bf16.mxu0 %v2071_v0  ;;  %v1875_v5 = vpack.c.bf16 %v1410_v4, %v1409_v3  ;;  %v1713_v9 = vld [vmem:[%s2539_s15] ss:$0 sm:$0xff]  ;;  %p1978_p3 = scmp.lt.s32.totalorder %s1976_s7, %s1970_s26 }
  0x5a   : > { %1855 = vmatpush3.bf16.msra.mxu1 %v1854_v31  ;;  %v1714_v16 = vld [vmem:[%s2541_s17] ss:$0 sm:$0xff]  ;;  %p1972_p10 = pnand %p1971_p5, %p2595_p9 }
  0x5b   : > { %1862 = vmatprep.subr.bf16.mxu1 %v2071_v0  ;;  %p1979_p4 = por %p1978_p3, %p1977_p2 }
  0x5c   : > { %p1973_p12 = pneg %p1972_p10 }
  0x5e   : > { %p1980_p7 = pnand %p1979_p4, %p1973_p12 }
 0x124   : > { %v824_v17 = vpop.f32.mrb[0].mxu0 }
 0x125   : > { %v1764_v18 = vpop.f32.mrb[1].mxu0 }
 0x128   : > { %v898_v19 = vpop.f32.mrb[0].mxu1 }
 0x129   : > { %v899_v21 = vadd.f32 %v898_v19, %v824_v17  ;;  %v1771_v22 = vpop.f32.mrb[1].mxu1 }
 0x12b   : > { %v909_v25 = vadd.f32 %v1704_v20, %v899_v21 }
 0x12d   : > { %v910_v27 = vmax.f32 %v909_v25, 0.0 }
 0x12f   : > { %1781 = vmatmul.mubr.msk.f32.vlgmr.msra.gmra.mrb[2].mxu0 %vm922_vm3, %v910_v27 }
 0x130   : > { %1858 = vmatpush3.bf16.msra.mxu0 %v1857_v26  ;;  %1802 = vmatprep.mubr.msk.f32.mxu0 %vm2073_vm0, %v2072_v1 }
 0x131   : > { %1859 = vmatprep.subr.bf16.mxu0 %v2071_v0 }
 0x134   : > { %1861 = vmatpush3.bf16.msra.mxu0 %v1860_v33 }
 0x135   : > { %1868 = vmatprep.subr.bf16.mxu0 %v2071_v0 }
 0x202   : > { %v992_v35 = vpop.f32.mrb[2].mxu0 }
 0x203   : > { %v993_v36 = vadd.f32 %v1705_v34, %v992_v35  ;;  %v1782_v37 = vpop.f32.mrb[3].mxu0 }
 0x205   : > { %v996_v38 = vmax.f32 %v993_v36, 0.0 }
 0x207   : > { %1792 = vmatmul.mubr.msk.f32.vlgmr.msra.gmra.mrb[2].mxu1 %vm922_vm3, %v996_v38  ;;  %1803 = vmatmul.mubr.msk.f32.vlgmr.msra.gmra.mrb[4].mxu0 %vm922_vm3, %v996_v38 }
 0x208   : > { %1809 = vmatprep.mubr.msk.f32.mxu1 %vm2073_vm0, %v2072_v1  ;;  %1827 = vmatprep.mubr.msk.f32.mxu0 %vm2073_vm0, %v2072_v1 }
 0x209   : > { %1864 = vmatpush3.bf16.msra.mxu1 %v1863_v41  ;;  %1870 = vmatpush3.bf16.msra.mxu0 %v1869_v62 }
 0x20a   : > { %1865 = vmatprep.subr.bf16.mxu1 %v2071_v0  ;;  %1871 = vmatprep.subr.bf16.mxu0 %v2071_v0 }
 0x2da   : > { %v1077_v44 = vpop.f32.mrb[2].mxu1  ;;  %v1158_v45 = vpop.f32.mrb[4].mxu0 }
 0x2db   : > { %v1078_v46 = vadd.f32 %v1707_v42, %v1077_v44  ;;  %v1159_v47 = vadd.f32 %v1709_v43, %v1158_v45  ;;  %v1793_v48 = vpop.f32.mrb[3].mxu1  ;;  %v1804_v49 = vpop.f32.mrb[5].mxu0 }
 0x2dd   : > { %v1162_v50 = vmax.f32 %v1159_v47, -4.0  ;;  %1498 = vst.msk [vmem:[%s2386_s3] sm:$0xff] %vm828_vm2, %v1078_v46 }
 0x2df   : > { %v1163_v51 = vmin.f32 %v1162_v50, 15.0 }
 0x2e1   : > { %v1164_v52 = vmul.f32 1.442695, %v1163_v51 }
 0x2e3   : > { %1938 = vpow2.f32 %v1164_v52 }
 0x2ed   : > { %v1939_v56 = vpop.eup %1938 }
 0x2ee   : > { %v1166_v57 = vmul.f32 %v1939_v56, %v750_v53  ;;  %1499 = vst.msk [vmem:[%s2400_s23] sm:$0xff] %vm828_vm2, %v1939_v56 }
 0x2f0   : > { %v1167_v59 = vadd.f32 %v1166_v57, %v1078_v46 }
 0x2f2   : > { %1810 = vmatmul.mubr.msk.f32.vlgmr.msra.gmra.mrb[4].mxu1 %vm828_vm2, %v1167_v59 }
 0x2f3   : > { %1867 = vmatpush3.bf16.msra.mxu1 %v1866_v58  ;;  %1816 = vmatprep.mubr.msk.f32.mxu1 %vm2073_vm0, %v2072_v1 }
 0x2f4   : > { %1874 = vmatprep.subr.bf16.mxu1 %v2071_v0 }
 0x2f6   : > { %1817 = vmatmul.mubr.msk.f32.vlgmr.msra.gmra.mrb[6].mxu1 %vm828_vm2, %v2303_v7 }
 0x2f7   : > { %1838 = vmatprep.mubr.msk.f32.mxu1 %vm2073_vm0, %v2072_v1  ;;  %v1327_v1 = vld [vmem:[%s2540_s16 + $0x18] sm:$0xff]  ;;  %1876 = vmatpush3.bf16.msra.mxu1 %v1875_v5 }
 0x2f8   : > { %v1872_v2 = vpack.c.bf16 %v1327_v1, %v1326_v63  ;;  %1877 = vmatprep.subr.bf16.mxu1 %v2071_v0  ;;  %v1411_v0 = vld [vmem:[%s2542_s18 + $0x10] sm:$0xff] }
 0x2f9   : > { %v1878_v15 = vpack.c.bf16 %v1412_v14, %v1411_v0 }
 0x2fa   : > { %1873 = vmatpush3.bf16.msra.mxu0 %v1872_v2 }
 0x2fb   : > { %1879 = vmatpush3.bf16.msra.mxu1 %v1878_v15 }
 0x3c5   : > { %v1241_v6 = vpop.f32.mrb[4].mxu1 }
 0x3c6   : > { %v1811_v7 = vpop.f32.mrb[5].mxu1 }
 0x3c9   : > { %v1311_v8 = vpop.f32.mrb[6].mxu1 }
 0x3ca   : > { %v1312_v10 = vadd.f32 %v1311_v8, %v1241_v6  ;;  %v1818_v11 = vpop.f32.mrb[7].mxu1 }
 0x3cc   : > { %v1322_v12 = vadd.f32 %v1713_v9, %v1312_v10 }
 0x3ce   : > { %v1323_v13 = vmax.f32 %v1322_v12, 0.0 }
 0x3d0   : > { %1828 = vmatmul.mubr.msk.f32.vlgmr.msra.gmra.mrb[6].mxu0 %vm922_vm3, %v1323_v13 }
 0x4a3   : > { %v1404_v17 = vpop.f32.mrb[6].mxu0 }
 0x4a4   : > { %v1405_v18 = vadd.f32 %v1714_v16, %v1404_v17  ;;  %v1829_v19 = vpop.f32.mrb[7].mxu0 }
 0x4a6   : > { %v1408_v20 = vmax.f32 %v1405_v18, 0.0 }
 0x4a8   : > { %1839 = vmatmul.mubr.msk.f32.vlgmr.msra.gmra.mrb[8].mxu1 %vm922_vm3, %v1408_v20 }
 0x4a9   : > { %1983 = shalt.err (!%p1980_p7)
}
 0x4aa   : > { %s1984_s3 = scalar_lea.hbm %s2453_s30, 128  ;;  %s1988_s27 = scalar_lea.hbm %s2545_s21, 256 }
 0x4ab   : > { %p1985_p8 = scmp.ne.s32.totalorder %s2453_s30, %s1984_s3  ;;  %p1989_p1 = scmp.lt.u32.totalorder %s2453_s30, %s2545_s21 }
 0x4ac   : > { %p1990_p0 = scmp.lt.u32.totalorder %s1988_s27, %s1984_s3  ;;  %p1992_p5 = scmp.lt.u32.totalorder %s1984_s3, %s2453_s30 }
 0x4ad   : > { %p1986_p11 = pnand %p1985_p8, %p2595_p9 }
 0x4ae   : > { %p1991_p6 = por %p1990_p0, %p1989_p1 }
 0x4af   : > { %p1987_p13 = pneg %p1986_p11 }
 0x4b0   : > { %p1993_p10 = por %p1992_p5, %p1991_p6 }
 0x4b2   : > { %p1994_p12 = pnand %p1993_p10, %p1987_p13 }
 0x4b4   : > { %1997 = shalt.err (!%p1994_p12)
}
 0x4b5   : > { %1884 = dma.vmem_to_hbm [thread:$0]  (%p2595_p9), %s1527_s5, 128, %s2453_s30, %s1505_s20  }
 0x4b6   : > { %s2596_s7 = sshll.u32 %s2215_s1, 7  ;;  %s1539_s25 = sshll.u32 %s2400_s23, 4  ;;  %s1540_s25 = int_to_ptr.vmem [resolvable:$true] %s1539_s25 }
 0x4b7   : > { %s2478_s29 = scalar_lea.hbm %s2546_s22, %s2596_s7  ;;  %s1510_s3 = scalar_lea.sflag [#allocation8], %s2377_s24 }
 0x4b8   : > { %s1998_s27 = scalar_lea.vmem %s1540_s25, 128  ;;  %s2075_s19 = smov [#allocation7]  }
 0x4b9   : > { %p1999_p2 = scmp.ne.s32.totalorder %s1540_s25, %s1998_s27  ;;  %s2002_s8 = sshll.u32 %s2075_s19, 4  ;;  %s2003_s8 = int_to_ptr.vmem [resolvable:$false] %s2002_s8 }
 0x4ba   : > { %s2004_s9 = scalar_lea.vmem %s2003_s8, 256  ;;  %p2005_p7 = scmp.lt.s32.totalorder %s1540_s25, %s2003_s8 }
 0x4bb   : > { %p2000_p3 = pnand %p1999_p2, %p2595_p9  ;;  %p2006_p8 = scmp.lt.s32.totalorder %s2004_s9, %s1998_s27 }
 0x4bd   : > { %p2001_p4 = pneg %p2000_p3  ;;  %p2007_p11 = por %p2006_p8, %p2005_p7 }
 0x4bf   : > { %p2008_p13 = pnand %p2007_p11, %p2001_p4 }
 0x4c1   : > { %2011 = shalt.err (!%p2008_p13)
}
 0x4c2   : > { %s2012_s1 = scalar_lea.hbm %s2478_s29, 128  ;;  %s2016_s5 = scalar_lea.hbm %s2546_s22, 256 }
 0x4c3   : > { %p2013_p1 = scmp.ne.s32.totalorder %s2478_s29, %s2012_s1  ;;  %p2017_p5 = scmp.lt.u32.totalorder %s2478_s29, %s2546_s22 }
 0x4c4   : > { %p2018_p10 = scmp.lt.u32.totalorder %s2016_s5, %s2012_s1  ;;  %p2020_p2 = scmp.lt.u32.totalorder %s2012_s1, %s2478_s29 }
 0x4c5   : > { %p2014_p0 = pnand %p2013_p1, %p2595_p9 }
 0x4c6   : > { %p2019_p12 = por %p2018_p10, %p2017_p5 }
 0x4c7   : > { %p2015_p6 = pneg %p2014_p0 }
 0x4c8   : > { %p2021_p3 = por %p2020_p2, %p2019_p12 }
 0x4ca   : > { %p2022_p4 = pnand %p2021_p3, %p2015_p6 }
 0x4cc   : > { %2025 = shalt.err (!%p2022_p4)
}
 0x4cd   : > { %1885 = dma.vmem_to_hbm [thread:$0]  (%p2595_p9), %s1540_s25, 128, %s2478_s29, %s1510_s3  }
 0x4ce   : > { %s2597_s7 = sld [smem:[#allocation28_spill]]  ;;  %s1493_s26 = sld [smem:[#allocation2]] }
 0x4cf   : > { %s2598_s19 = sld [smem:[#allocation29_spill]] }
 0x4d4   : > { %v1716_v21 = vld [vmem:[%s2597_s7] ss:$0 sm:$0xff]  ;;  %v1495_v25 = vstv %s1493_s26 }
 0x4d5   : > { %s747_s1 = scalar_lea.vmem %s2598_s19, %s2285_s0 }
 0x57b   : > { %v1489_v22 = vpop.f32.mrb[8].mxu1 }
 0x57c   : > { %v1490_v23 = vadd.f32 %v1716_v21, %v1489_v22  ;;  %v1840_v24 = vpop.f32.mrb[9].mxu1 }
 0x57e   : > { %1940 = vtanh.f32 %v1490_v23 }
 0x588   : > { %v1941_v26 = vpop.eup %1940 }
 0x589   : > { %v1496_v27 = vmul.f32 %v1941_v26, %v1495_v25 }
 0x58b   : > { %1497 = vst.msk [vmem:[%s747_s1] sm:$0xff] %vm754_vm1, %v1496_v27 }
 0x58c PF: > { %s2599_s2 = sld [smem:[#allocation14_spill]]  ;;  %s2600_s29 = sld [smem:[#allocation12_spill]] }
 0x58d   : > { %s2601_s25 = sld [smem:[#allocation17_spill]] }
 0x592   : > { %p1901_p9 = scmp.ge.s32.totalorder %s2599_s2, 2  ;;  %s1558_s3 = sand.u32 1, %s2600_s29  }
 0x593   : > { %p2602_p7 = scmp.ne.s32.totalorder %s2601_s25, 0  ;;  %s1559_s24 = scalar_lea.sflag [#allocation5], %s1558_s3 }
 0x595   : > { %p1893_p8 = pnand %p1901_p9, %p2602_p7 }
 0x597   : > { %2047 = dma.done.wait (!%p1893_p8), %s1559_s24, 128  }
 0x598   : > { %2049 = vsyncadd (!%p1893_p8), %s1559_s24, 4294967168  ;;  %s1568_s23 = scalar_lea.sflag [#allocation8], %s1558_s3 }
 0x599   : > { %2051 = dma.done.wait (!%p1893_p8), %s1568_s23, 128  }
 0x59a   : > { %2053 = vsyncadd (!%p1893_p8), %s1568_s23, 4294967168  ;;  %s2603_s23 = sld [smem:[#allocation15_spill]]  ;;  %s2604_s0 = sld [smem:[#allocation13_spill]] }
 0x59b   : > { %s2605_s5 = sld [smem:[#allocation16_spill]]  ;;  %s2606_s30 = smov %s2060_s4 }
 0x5a0   : > { %p38_p11 = scmp.ge.s32.totalorder %s2603_s23, 4   ;;  %s2607_s4 = smov %s2604_s0 }
 0x5a1   : > { %s2608_s0 = smov %s2605_s5 }
 0x5a2   :  { %40 = sbr.rel (!%p38_p11) target bundleno = 20 (0x14), region = 175 }
 0x5a9   :  { %1573 = vsyncpa [#allocation4], 1 }
 0x5aa   :  { %1575 = vsyncpa [#allocation4 + $0x1], 1 }
 0x5ab   :  { %1576 = vsyncpa [#allocation5], 1 }
 0x5ac   :  { %1578 = vsyncpa [#allocation5 + $0x1], 1 }
 0x5ad   :  { %1579 = vsyncpa [#allocation8], 1 }
 0x5ae   :  { %1581 = vsyncpa [#allocation8 + $0x1], 1 }

// kernel: tpu_custom_call.1
= control target key start
LH: loop header
LB: loop body
LE: loop exit
PB: predicated region body
PF: predicated region fallthrough
CT: control target
= control target key end

     0   :  { %s2524_s0 = inlined_call_operand.<no memory space> [shape: f32[1,1], index: 0, kind: input, shape index: {}]   ;;  %s2525_s1 = inlined_call_operand.vmem [shape: f32[16,16], index: 1, kind: input, shape index: {}]   ;;  %s2526_s2 = inlined_call_operand.vmem [shape: f32[16,8], index: 2, kind: input, shape index: {}]   ;;  %s2527_s3 = inlined_call_operand.vmem [shape: f32[16,16], index: 3, kind: input, shape index: {}]   ;;  %s2528_s4 = inlined_call_operand.vmem [shape: f32[16,32], index: 4, kind: input, shape index: {}]   ;;  %s2529_s5 = inlined_call_operand.hbm [shape: f32[8,32], index: 5, kind: input, shape index: {}]   ;;  %s2530_s6 = inlined_call_operand.vmem [shape: f32[1,32], index: 6, kind: input, shape index: {}]   ;;  %s2531_s7 = inlined_call_operand.vmem [shape: f32[32,32], index: 7, kind: input, shape index: {}]   ;;  %s2532_s8 = inlined_call_operand.vmem [shape: f32[1,32], index: 8, kind: input, shape index: {}]   ;;  %s2533_s9 = inlined_call_operand.vmem [shape: f32[32,16], index: 9, kind: input, shape index: {}]   ;;  %s2534_s10 = inlined_call_operand.vmem [shape: f32[1,16], index: 10, kind: input, shape index: {}]   ;;  %s2535_s11 = inlined_call_operand.vmem [shape: f32[32,16], index: 11, kind: input, shape index: {}]   ;;  %s2536_s12 = inlined_call_operand.vmem [shape: f32[1,16], index: 12, kind: input, shape index: {}]   ;;  %s2537_s13 = inlined_call_operand.vmem [shape: f32[16,32], index: 13, kind: input, shape index: {}]   ;;  %s2538_s14 = inlined_call_operand.vmem [shape: f32[16,32], index: 14, kind: input, shape index: {}]   ;;  %s2539_s15 = inlined_call_operand.vmem [shape: f32[1,32], index: 15, kind: input, shape index: {}]   ;;  %s2540_s16 = inlined_call_operand.vmem [shape: f32[32,32], index: 16, kind: input, shape index: {}]   ;;  %s2541_s17 = inlined_call_operand.vmem [shape: f32[1,32], index: 17, kind: input, shape index: {}]   ;;  %s2542_s18 = inlined_call_operand.vmem [shape: f32[32,8], index: 18, kind: input, shape index: {}]   ;;  %s2543_s19 = inlined_call_operand.vmem [shape: f32[1,8], index: 19, kind: input, shape index: {}]   ;;  %s2544_s20 = inlined_call_operand.vmem [shape: f32[16,8], index: 20, kind: output, shape index: {0}]   ;;  %s2545_s21 = inlined_call_operand.hbm [shape: f32[16,16], index: 21, kind: output, shape index: {1}]   ;;  %s2546_s22 = inlined_call_operand.hbm [shape: f32[16,16], index: 22, kind: output, shape index: {2}]  }
   0x1   :  { %2560 = sst [smem:[#allocation18_spill]] %s2524_s0 }
   0x2   :  { %2561 = sst [smem:[#allocation19_spill]] %s2525_s1  ;;  %s2572_s29 = sld [smem:[#allocation18_spill]] }
   0x3   :  { %2562 = sst [smem:[#allocation20_spill]] %s2526_s2 }
   0x4   :  { %2563 = sst [smem:[#allocation21_spill]] %s2527_s3 }
   0x5   :  { %2564 = sst [smem:[#allocation22_spill]] %s2528_s4 }
   0x6   :  { %2565 = sst [smem:[#allocation23_spill]] %s2529_s5 }
   0x7   :  { %2566 = sst [smem:[#allocation24_spill]] %s2530_s6 }
   0x8   :  { %2567 = sst [smem:[#allocation25_spill]] %s2531_s7 }
   0x9   :  { %2568 = sst [smem:[#allocation26_spill]] %s2532_s8 }
   0xa   :  { %2569 = sst [smem:[#allocation27_spill]] %s2533_s9 }
   0xb   :  { %2570 = sst [smem:[#allocation28_spill]] %s2543_s19 }
   0xc   :  { %2571 = sst [smem:[#allocation29_spill]] %s2544_s20 }
   0xd   :  { %28 = sst [smem:[#allocation2]] %s2572_s29 }
   0xe   :  { %29 = vsyncpa [#allocation4], 0 }
   0xf   :  { %30 = vsyncpa [#allocation5], 0 }
  0x10   :  { %32 = vsyncpa [#allocation5 + $0x1], 0 }
  0x11   :  { %33 = vsyncpa [#allocation8], 0 }
  0x12   :  { %35 = vsyncpa [#allocation8 + $0x1], 0  ;;  %s2194_s30 = smov 0   ;;  %s2196_s4 = smov 0  }
  0x13   :  { %s2198_s0 = smov 0   ;;  %s2200_s23 = smov 0  }
  0x14 LB: > { %2573 = sst [smem:[#allocation12_spill]] %s2056_s30  ;;  %s2215_s1 = sadd.s32 4294967295, %s2068_s23   ;;  %s2068_s23 = sphi %s2200_s23, %s2603_s23   ;;  %s2064_s0 = sphi %s2198_s0, %s2608_s0   ;;  %s2060_s4 = sphi %s2196_s4, %s2607_s4   ;;  %s2056_s30 = sphi %s2194_s30, %s2606_s30  }
  0x15   : > { %2574 = sst [smem:[#allocation13_spill]] %s2064_s0  ;;  %s1690_s5 = sadd.s32 4294967294, %s2068_s23  }
  0x16   : > { %2575 = sst [smem:[#allocation14_spill]] %s2068_s23  ;;  %s2219_s24 = sadd.s32 1, %s2068_s23  }
  0x17   : > { %2576 = sst [smem:[#allocation15_spill]] %s2219_s24  ;;  %s509_s6 = sadd.s32 1, %s2064_s0 }
  0x18   : > { %s506_s25 = ssub.s32 %s2068_s23, %s2219_s24  ;;  %p519_p0 = scmp.ne.s32.totalorder %s2064_s0, %s2060_s4 }
  0x19   : > { %p507_p1 = scmp.eq.s32.totalorder %s506_s25, 0  ;;  %p520_p2 = scmp.eq.s32.totalorder %s2215_s1, 1 }
  0x1a   : > { %p525_p3 = scmp.ne.s32.totalorder %s2060_s4, %s2056_s30  ;;  %p526_p4 = scmp.eq.s32.totalorder %s1690_s5, 1 }
  0x1b   : > { %s2230_s26 = scalar_select %p507_p1, %s2064_s0, %s509_s6  }
  0x1c   : > { %p2232_p5 = por %p520_p2, %p519_p0  ;;  %p2236_p6 = por %p526_p4, %p525_p3 }
  0x1d   : > { %2577 = sst [smem:[#allocation16_spill]] %s2230_s26  ;;  %p1691_p7 = scmp.ge.s32.totalorder %s2068_s23, 1 }
  0x1e   : > { %s2578_s2 = scalar_select %p2232_p5, 1, 0 }
  0x1f   : > { %s2579_s27 = scalar_select %p2236_p6, 1, 0 }
  0x20   : > { %p559_p8 = scmp.lt.s32.totalorder %s2068_s23, 3  ;;  %p2555_p9 = scmp.eq.s32.totalorder %s2215_s1, 0 }
  0x21   : > { %2580 = sst [smem:[#allocation17_spill]] %s2579_s27  ;;  %s2070_s28 = smov [#allocation3]  }
  0x22   : > { %p2243_p10 = pnand %p1691_p7, %p559_p8  ;;  %s578_s29 = sshll.u32 %s2070_s28, 4  ;;  %s579_s29 = int_to_ptr.vmem [resolvable:$true] %s578_s29 }
  0x23   : > { %s2583_s26 = sld [smem:[#allocation23_spill]] }
  0x24   : > { %s2581_s3 = scalar_select %p2243_p10, 1, 0 }
  0x25   : > { %p1888_p11 = pneg %p2243_p10 }
  0x27   : > { %p2251_p12 = pnand %p2555_p9, %p1888_p11 }
  0x29   : > { %s1942_s0 = scalar_lea.hbm %s2583_s26, 128  ;;  %p1944_p0 = pneg %p2251_p12 }
  0x2a   : > { %p1943_p13 = scmp.ne.s32.totalorder %s2583_s26, %s1942_s0  ;;  %p1949_p3 = scmp.lt.u32.totalorder %s1942_s0, %s2583_s26 }
  0x2c   : > { %p1945_p1 = pnand %p1944_p0, %p1943_p13 }
  0x2e   : > { %p1946_p2 = pneg %p1945_p1 }
  0x30   : > { %p1951_p4 = pnand %p1949_p3, %p1946_p2 }
  0x32   : > { %1954 = shalt.err (!%p1951_p4)
}
  0x33   : > { %s1955_s23 = scalar_lea.vmem %s579_s29, 128  ;;  %p1963_p9 = scmp.lt.s32.totalorder %s579_s29, %s579_s29 }
  0x34   : > { %p1956_p7 = scmp.ne.s32.totalorder %s579_s29, %s1955_s23  ;;  %p1964_p6 = scmp.lt.s32.totalorder %s1955_s23, %s1955_s23 }
  0x36   : > { %p1958_p8 = pnand %p1956_p7, %p1944_p0  ;;  %p1965_p5 = por %p1964_p6, %p1963_p9 }
  0x38   : > { %p1959_p11 = pneg %p1958_p8 }
  0x3a   : > { %p1966_p10 = pnand %p1965_p5, %p1959_p11 }
  0x3c   : > { %1969 = shalt.err (!%p1966_p10)
}
  0x3d   : > { %1891 = dma.hbm_to_vmem [thread:$0]  (!%p2251_p12), %s2583_s26, 128, %s579_s29, [#allocation4]  }
  0x3e   : > { %p2584_p13 = scmp.ne.s32.totalorder %s2581_s3, 0 }
  0x3f   : > { %p2585_p1 = scmp.eq.s32.totalorder (!%p2584_p13), %s2215_s1, 0 }
  0x40   : > { %654 = sbr.rel (%p2584_p13) target bundleno = 1420 (0x58c), region = 100 }
  0x47   : > { %2043 = dma.done.wait (%p2585_p1), [#allocation4], 128   ;;  %p2586_p0 = pmov %p2585_p1 }
  0x48   : > { %p732_p6 = scmp.lt.s32.totalorder %s2215_s1, 1  ;;  %v2071_v0 = vmov 0.0|0.0   ;;  %v2072_v1 = vmov 0.0   ;;  %vm2073_vm0 = vmmov 0   ;;  %s2587_s29 = sld [smem:[#allocation20_spill]]  ;;  %vm754_vm1 = vcmask 64512  }
  0x49   : > { %2045 = vsyncadd (%p2586_p0), [#allocation4], 4294967168  ;;  %1841 = vmatprep.subr.bf16.mxu1 %v2071_v0  ;;  %1760 = vmatprep.subr.mxu0 %v2072_v1  ;;  %s2588_s28 = sld [smem:[#allocation22_spill]]  ;;  %v753_v4 = vld [vmem:[#allocation3] sm:$0xff]  ;;  %vm828_vm2 = vcmask 130048   ;;  %s2590_s7 = sld [smem:[#allocation25_spill]] }
  0x4a   : > { %1762 = vmatprep.mubr.msk.f32.mxu0 %vm2073_vm0, %v2072_v1  ;;  %s733_s30 = scalar_select %p732_p6, %s2215_s1, 1  ;;  %1769 = vmatprep.mubr.msk.f32.mxu1 %vm2073_vm0, %v2072_v1  ;;  %v1081_v23 = vld [vmem:[%s2535_s11] sm:$0xff]  ;;  %v1082_v24 = vld [vmem:[%s2535_s11 + $0x8] sm:$0xff]  ;;  %vm922_vm3 = vcmask 261120   ;;  %v1083_v30 = vld [vmem:[%s2535_s11 + $0x10] sm:$0xff] }
  0x4b   : > { %1761 = vmatpush3.msra.mxu0 %v753_v4  ;;  %s2591_s9 = sld [smem:[#allocation27_spill]]  ;;  %s2592_s23 = sld [smem:[#allocation24_spill]]  ;;  %v1857_v26 = vpack.c.bf16 %v1082_v24, %v1081_v23  ;;  %v1084_v32 = vld [vmem:[%s2535_s11 + $0x18] sm:$0xff]  ;;  %v1170_v39 = vld [vmem:[%s2538_s14] sm:$0xff]  ;;  %v1171_v40 = vld [vmem:[%s2538_s14 + $0x8] sm:$0xff] }
  0x4c   : > { %s2285_s0 = sshll.u32 %s733_s30, 3  ;;  %s2589_s30 = sld [smem:[#allocation19_spill]]  ;;  %1844 = vmatprep.subr.bf16.mxu0 %v2071_v0  ;;  %v1860_v33 = vpack.c.bf16 %v1084_v32, %v1083_v30  ;;  %v1863_v41 = vpack.c.bf16 %v1171_v40, %v1170_v39  ;;  %v1707_v42 = vld [vmem:[%s2534_s10] ss:$0 sm:$0xff]  ;;  %v1169_v55 = vld [vmem:[%s2537_s13 + $0x8] sm:$0xff]  ;;  %v1326_v63 = vld [vmem:[%s2540_s16 + $0x10] sm:$0xff] }
  0x4d   : > { %s2593_s8 = sld [smem:[#allocation26_spill]]  ;;  %s2377_s24 = sand.u32 1, %s2060_s4   ;;  %v1709_v43 = vld [vmem:[%s2536_s12] ss:$0 sm:$0xff]  ;;  %v1325_v61 = vld [vmem:[%s2540_s16 + $0x8] sm:$0xff] }
  0x4e   : > { %s739_s5 = scalar_lea.vmem %s2587_s29, %s2285_s0  ;;  %s1696_s27 = sshll.u32 %s2377_s24, 3  ;;  %v1168_v54 = vld [vmem:[%s2537_s13] sm:$0xff]  ;;  %v1410_v4 = vld [vmem:[%s2542_s18 + $0x8] sm:$0xff] }
  0x4f   : > { %v751_v2 = vld [vmem:[%s2588_s28] sm:$0xff]  ;;  %v752_v3 = vld [vmem:[%s2588_s28 + $0x8] sm:$0xff]  ;;  %v913_v11 = vld [vmem:[%s2590_s7 + $0x10] sm:$0xff]  ;;  %s2386_s3 = scalar_lea.vmem [#allocation6], %s1696_s27  ;;  %v1866_v58 = vpack.c.bf16 %v1169_v55, %v1168_v54  ;;  %s2559_s29 = sshll.u32 %s2215_s1, 7 }
  0x50   : > { %v1842_v5 = vpack.c.bf16 %v752_v3, %v751_v2  ;;  %v749_v6 = vld [vmem:[%s739_s5] sm:$0xff]  ;;  %v912_v9 = vld [vmem:[%s2590_s7 + $0x8] sm:$0xff]  ;;  %v914_v12 = vld [vmem:[%s2590_s7 + $0x18] sm:$0xff]  ;;  %s2594_s5 = sld [smem:[#allocation21_spill]]  ;;  %s1505_s20 = scalar_lea.sflag [#allocation5], %s2377_s24 }
  0x51   : > { %1763 = vmatmul.mubr.msk.f32.vlgmr.msra.gmra.mrb[0].mxu0 %vm754_vm1, %v749_v6  ;;  %v911_v8 = vld [vmem:[%s2590_s7] sm:$0xff]  ;;  %v1848_v13 = vpack.c.bf16 %v914_v12, %v913_v11  ;;  %v998_v15 = vld [vmem:[%s2591_s9 + $0x8] sm:$0xff]  ;;  %v999_v28 = vld [vmem:[%s2591_s9 + $0x10] sm:$0xff]  ;;  %p2595_p9 = scmp.ne.s32.totalorder %s2578_s2, 0 }
  0x52   : > { %s735_s19 = scalar_lea.vmem %s2589_s30, %s2285_s0  ;;  %1843 = vmatpush3.bf16.msra.mxu1 %v1842_v5  ;;  %1780 = vmatprep.mubr.msk.f32.mxu0 %vm2073_vm0, %v2072_v1  ;;  %v1845_v10 = vpack.c.bf16 %v912_v9, %v911_v8  ;;  %v997_v14 = vld [vmem:[%s2591_s9] sm:$0xff]  ;;  %v1000_v29 = vld [vmem:[%s2591_s9 + $0x18] sm:$0xff]  ;;  %s2453_s30 = scalar_lea.hbm %s2545_s21, %s2559_s29 }
  0x53   : > { %v2303_v7 = vld [vmem:[%s735_s19] sm:$0xff]  ;;  %1850 = vmatprep.subr.bf16.mxu1 %v2071_v0  ;;  %v1851_v16 = vpack.c.bf16 %v998_v15, %v997_v14  ;;  %v1854_v31 = vpack.c.bf16 %v1000_v29, %v999_v28  ;;  %v1412_v14 = vld [vmem:[%s2542_s18 + $0x18] sm:$0xff] }
  0x54   : > { %1846 = vmatpush3.bf16.msra.mxu0 %v1845_v10  ;;  %v1704_v20 = vld [vmem:[%s2592_s23] ss:$0 sm:$0xff]  ;;  %s2400_s23 = scalar_lea.vmem [#allocation7], %s1696_s27  ;;  %s2074_s27 = smov [#allocation6]  }
  0x55   : > { %1770 = vmatmul.mubr.msk.f32.vlgmr.msra.gmra.mrb[0].mxu1 %vm828_vm2, %v2303_v7  ;;  %1847 = vmatprep.subr.bf16.mxu0 %v2071_v0  ;;  %v1705_v34 = vld [vmem:[%s2593_s8] ss:$0 sm:$0xff]  ;;  %s1974_s19 = sshll.u32 %s2074_s27, 4  ;;  %s1975_s19 = int_to_ptr.vmem [resolvable:$false] %s1974_s19 }
  0x56   : > { %1791 = vmatprep.mubr.msk.f32.mxu1 %vm2073_vm0, %v2072_v1  ;;  %1852 = vmatpush3.bf16.msra.mxu1 %v1851_v16  ;;  %s743_s6 = scalar_lea.vmem %s2594_s5, %s2285_s0  ;;  %v1324_v60 = vld [vmem:[%s2540_s16] sm:$0xff]  ;;  %s1526_s5 = sshll.u32 %s2386_s3, 4  ;;  %s1527_s5 = int_to_ptr.vmem [resolvable:$true] %s1526_s5 }
  0x57   : > { %1853 = vmatprep.subr.bf16.mxu1 %v2071_v0  ;;  %v750_v53 = vld [vmem:[%s743_s6] sm:$0xff]  ;;  %v1869_v62 = vpack.c.bf16 %v1325_v61, %v1324_v60  ;;  %s1970_s26 = scalar_lea.vmem %s1527_s5, 128  ;;  %s1976_s7 = scalar_lea.vmem %s1975_s19, 256 }
  0x58   : > { %1849 = vmatpush3.bf16.msra.mxu0 %v1848_v13  ;;  %v1409_v3 = vld [vmem:[%s2542_s18] sm:$0xff]  ;;  %p1971_p5 = scmp.ne.s32.totalorder %s1527_s5, %s1970_s26  ;;  %p1977_p2 = scmp.lt.s32.totalorder %s1527_s5, %s1975_s19 }
  0x59   : > { %1856 = vmatprep.subr.bf16.mxu0 %v2071_v0  ;;  %v1875_v5 = vpack.c.bf16 %v1410_v4, %v1409_v3  ;;  %v1713_v9 = vld [vmem:[%s2539_s15] ss:$0 sm:$0xff]  ;;  %p1978_p3 = scmp.lt.s32.totalorder %s1976_s7, %s1970_s26 }
  0x5a   : > { %1855 = vmatpush3.bf16.msra.mxu1 %v1854_v31  ;;  %v1714_v16 = vld [vmem:[%s2541_s17] ss:$0 sm:$0xff]  ;;  %p1972_p10 = pnand %p1971_p5, %p2595_p9 }
  0x5b   : > { %1862 = vmatprep.subr.bf16.mxu1 %v2071_v0  ;;  %p1979_p4 = por %p1978_p3, %p1977_p2 }
  0x5c   : > { %p1973_p12 = pneg %p1972_p10 }
  0x5e   : > { %p1980_p7 = pnand %p1979_p4, %p1973_p12 }
 0x124   : > { %v824_v17 = vpop.f32.mrb[0].mxu0 }
 0x125   : > { %v1764_v18 = vpop.f32.mrb[1].mxu0 }
 0x128   : > { %v898_v19 = vpop.f32.mrb[0].mxu1 }
 0x129   : > { %v899_v21 = vadd.f32 %v898_v19, %v824_v17  ;;  %v1771_v22 = vpop.f32.mrb[1].mxu1 }
 0x12b   : > { %v909_v25 = vadd.f32 %v1704_v20, %v899_v21 }
 0x12d   : > { %v910_v27 = vmax.f32 %v909_v25, 0.0 }
 0x12f   : > { %1781 = vmatmul.mubr.msk.f32.vlgmr.msra.gmra.mrb[2].mxu0 %vm922_vm3, %v910_v27 }
 0x130   : > { %1858 = vmatpush3.bf16.msra.mxu0 %v1857_v26  ;;  %1802 = vmatprep.mubr.msk.f32.mxu0 %vm2073_vm0, %v2072_v1 }
 0x131   : > { %1859 = vmatprep.subr.bf16.mxu0 %v2071_v0 }
 0x134   : > { %1861 = vmatpush3.bf16.msra.mxu0 %v1860_v33 }
 0x135   : > { %1868 = vmatprep.subr.bf16.mxu0 %v2071_v0 }
 0x202   : > { %v992_v35 = vpop.f32.mrb[2].mxu0 }
 0x203   : > { %v993_v36 = vadd.f32 %v1705_v34, %v992_v35  ;;  %v1782_v37 = vpop.f32.mrb[3].mxu0 }
 0x205   : > { %v996_v38 = vmax.f32 %v993_v36, 0.0 }
 0x207   : > { %1792 = vmatmul.mubr.msk.f32.vlgmr.msra.gmra.mrb[2].mxu1 %vm922_vm3, %v996_v38  ;;  %1803 = vmatmul.mubr.msk.f32.vlgmr.msra.gmra.mrb[4].mxu0 %vm922_vm3, %v996_v38 }
 0x208   : > { %1809 = vmatprep.mubr.msk.f32.mxu1 %vm2073_vm0, %v2072_v1  ;;  %1827 = vmatprep.mubr.msk.f32.mxu0 %vm2073_vm0, %v2072_v1 }
 0x209   : > { %1864 = vmatpush3.bf16.msra.mxu1 %v1863_v41  ;;  %1870 = vmatpush3.bf16.msra.mxu0 %v1869_v62 }
 0x20a   : > { %1865 = vmatprep.subr.bf16.mxu1 %v2071_v0  ;;  %1871 = vmatprep.subr.bf16.mxu0 %v2071_v0 }
 0x2da   : > { %v1077_v44 = vpop.f32.mrb[2].mxu1  ;;  %v1158_v45 = vpop.f32.mrb[4].mxu0 }
 0x2db   : > { %v1078_v46 = vadd.f32 %v1707_v42, %v1077_v44  ;;  %v1159_v47 = vadd.f32 %v1709_v43, %v1158_v45  ;;  %v1793_v48 = vpop.f32.mrb[3].mxu1  ;;  %v1804_v49 = vpop.f32.mrb[5].mxu0 }
 0x2dd   : > { %v1162_v50 = vmax.f32 %v1159_v47, -4.0  ;;  %1498 = vst.msk [vmem:[%s2386_s3] sm:$0xff] %vm828_vm2, %v1078_v46 }
 0x2df   : > { %v1163_v51 = vmin.f32 %v1162_v50, 15.0 }
 0x2e1   : > { %v1164_v52 = vmul.f32 1.442695, %v1163_v51 }
 0x2e3   : > { %1938 = vpow2.f32 %v1164_v52 }
 0x2ed   : > { %v1939_v56 = vpop.eup %1938 }
 0x2ee   : > { %v1166_v57 = vmul.f32 %v1939_v56, %v750_v53  ;;  %1499 = vst.msk [vmem:[%s2400_s23] sm:$0xff] %vm828_vm2, %v1939_v56 }
 0x2f0   : > { %v1167_v59 = vadd.f32 %v1166_v57, %v1078_v46 }
 0x2f2   : > { %1810 = vmatmul.mubr.msk.f32.vlgmr.msra.gmra.mrb[4].mxu1 %vm828_vm2, %v1167_v59 }
 0x2f3   : > { %1867 = vmatpush3.bf16.msra.mxu1 %v1866_v58  ;;  %1816 = vmatprep.mubr.msk.f32.mxu1 %vm2073_vm0, %v2072_v1 }
 0x2f4   : > { %1874 = vmatprep.subr.bf16.mxu1 %v2071_v0 }
 0x2f6   : > { %1817 = vmatmul.mubr.msk.f32.vlgmr.msra.gmra.mrb[6].mxu1 %vm828_vm2, %v2303_v7 }
 0x2f7   : > { %1838 = vmatprep.mubr.msk.f32.mxu1 %vm2073_vm0, %v2072_v1  ;;  %v1327_v1 = vld [vmem:[%s2540_s16 + $0x18] sm:$0xff]  ;;  %1876 = vmatpush3.bf16.msra.mxu1 %v1875_v5 }
 0x2f8   : > { %v1872_v2 = vpack.c.bf16 %v1327_v1, %v1326_v63  ;;  %1877 = vmatprep.subr.bf16.mxu1 %v2071_v0  ;;  %v1411_v0 = vld [vmem:[%s2542_s18 + $0x10] sm:$0xff] }
 0x2f9   : > { %v1878_v15 = vpack.c.bf16 %v1412_v14, %v1411_v0 }
 0x2fa   : > { %1873 = vmatpush3.bf16.msra.mxu0 %v1872_v2 }
 0x2fb   : > { %1879 = vmatpush3.bf16.msra.mxu1 %v1878_v15 }
 0x3c5   : > { %v1241_v6 = vpop.f32.mrb[4].mxu1 }
 0x3c6   : > { %v1811_v7 = vpop.f32.mrb[5].mxu1 }
 0x3c9   : > { %v1311_v8 = vpop.f32.mrb[6].mxu1 }
 0x3ca   : > { %v1312_v10 = vadd.f32 %v1311_v8, %v1241_v6  ;;  %v1818_v11 = vpop.f32.mrb[7].mxu1 }
 0x3cc   : > { %v1322_v12 = vadd.f32 %v1713_v9, %v1312_v10 }
 0x3ce   : > { %v1323_v13 = vmax.f32 %v1322_v12, 0.0 }
 0x3d0   : > { %1828 = vmatmul.mubr.msk.f32.vlgmr.msra.gmra.mrb[6].mxu0 %vm922_vm3, %v1323_v13 }
 0x4a3   : > { %v1404_v17 = vpop.f32.mrb[6].mxu0 }
 0x4a4   : > { %v1405_v18 = vadd.f32 %v1714_v16, %v1404_v17  ;;  %v1829_v19 = vpop.f32.mrb[7].mxu0 }
 0x4a6   : > { %v1408_v20 = vmax.f32 %v1405_v18, 0.0 }
 0x4a8   : > { %1839 = vmatmul.mubr.msk.f32.vlgmr.msra.gmra.mrb[8].mxu1 %vm922_vm3, %v1408_v20 }
 0x4a9   : > { %1983 = shalt.err (!%p1980_p7)
}
 0x4aa   : > { %s1984_s3 = scalar_lea.hbm %s2453_s30, 128  ;;  %s1988_s27 = scalar_lea.hbm %s2545_s21, 256 }
 0x4ab   : > { %p1985_p8 = scmp.ne.s32.totalorder %s2453_s30, %s1984_s3  ;;  %p1989_p1 = scmp.lt.u32.totalorder %s2453_s30, %s2545_s21 }
 0x4ac   : > { %p1990_p0 = scmp.lt.u32.totalorder %s1988_s27, %s1984_s3  ;;  %p1992_p5 = scmp.lt.u32.totalorder %s1984_s3, %s2453_s30 }
 0x4ad   : > { %p1986_p11 = pnand %p1985_p8, %p2595_p9 }
 0x4ae   : > { %p1991_p6 = por %p1990_p0, %p1989_p1 }
 0x4af   : > { %p1987_p13 = pneg %p1986_p11 }
 0x4b0   : > { %p1993_p10 = por %p1992_p5, %p1991_p6 }
 0x4b2   : > { %p1994_p12 = pnand %p1993_p10, %p1987_p13 }
 0x4b4   : > { %1997 = shalt.err (!%p1994_p12)
}
 0x4b5   : > { %1884 = dma.vmem_to_hbm [thread:$0]  (%p2595_p9), %s1527_s5, 128, %s2453_s30, %s1505_s20  }
 0x4b6   : > { %s2596_s7 = sshll.u32 %s2215_s1, 7  ;;  %s1539_s25 = sshll.u32 %s2400_s23, 4  ;;  %s1540_s25 = int_to_ptr.vmem [resolvable:$true] %s1539_s25 }
 0x4b7   : > { %s2478_s29 = scalar_lea.hbm %s2546_s22, %s2596_s7  ;;  %s1510_s3 = scalar_lea.sflag [#allocation8], %s2377_s24 }
 0x4b8   : > { %s1998_s27 = scalar_lea.vmem %s1540_s25, 128  ;;  %s2075_s19 = smov [#allocation7]  }
 0x4b9   : > { %p1999_p2 = scmp.ne.s32.totalorder %s1540_s25, %s1998_s27  ;;  %s2002_s8 = sshll.u32 %s2075_s19, 4  ;;  %s2003_s8 = int_to_ptr.vmem [resolvable:$false] %s2002_s8 }
 0x4ba   : > { %s2004_s9 = scalar_lea.vmem %s2003_s8, 256  ;;  %p2005_p7 = scmp.lt.s32.totalorder %s1540_s25, %s2003_s8 }
 0x4bb   : > { %p2000_p3 = pnand %p1999_p2, %p2595_p9  ;;  %p2006_p8 = scmp.lt.s32.totalorder %s2004_s9, %s1998_s27 }
 0x4bd   : > { %p2001_p4 = pneg %p2000_p3  ;;  %p2007_p11 = por %p2006_p8, %p2005_p7 }
 0x4bf   : > { %p2008_p13 = pnand %p2007_p11, %p2001_p4 }
 0x4c1   : > { %2011 = shalt.err (!%p2008_p13)
}
 0x4c2   : > { %s2012_s1 = scalar_lea.hbm %s2478_s29, 128  ;;  %s2016_s5 = scalar_lea.hbm %s2546_s22, 256 }
 0x4c3   : > { %p2013_p1 = scmp.ne.s32.totalorder %s2478_s29, %s2012_s1  ;;  %p2017_p5 = scmp.lt.u32.totalorder %s2478_s29, %s2546_s22 }
 0x4c4   : > { %p2018_p10 = scmp.lt.u32.totalorder %s2016_s5, %s2012_s1  ;;  %p2020_p2 = scmp.lt.u32.totalorder %s2012_s1, %s2478_s29 }
 0x4c5   : > { %p2014_p0 = pnand %p2013_p1, %p2595_p9 }
 0x4c6   : > { %p2019_p12 = por %p2018_p10, %p2017_p5 }
 0x4c7   : > { %p2015_p6 = pneg %p2014_p0 }
 0x4c8   : > { %p2021_p3 = por %p2020_p2, %p2019_p12 }
 0x4ca   : > { %p2022_p4 = pnand %p2021_p3, %p2015_p6 }
 0x4cc   : > { %2025 = shalt.err (!%p2022_p4)
}
 0x4cd   : > { %1885 = dma.vmem_to_hbm [thread:$0]  (%p2595_p9), %s1540_s25, 128, %s2478_s29, %s1510_s3  }
 0x4ce   : > { %s2597_s7 = sld [smem:[#allocation28_spill]]  ;;  %s1493_s26 = sld [smem:[#allocation2]] }
 0x4cf   : > { %s2598_s19 = sld [smem:[#allocation29_spill]] }
 0x4d4   : > { %v1716_v21 = vld [vmem:[%s2597_s7] ss:$0 sm:$0xff]  ;;  %v1495_v25 = vstv %s1493_s26 }
 0x4d5   : > { %s747_s1 = scalar_lea.vmem %s2598_s19, %s2285_s0 }
 0x57b   : > { %v1489_v22 = vpop.f32.mrb[8].mxu1 }
 0x57c   : > { %v1490_v23 = vadd.f32 %v1716_v21, %v1489_v22  ;;  %v1840_v24 = vpop.f32.mrb[9].mxu1 }
 0x57e   : > { %1940 = vtanh.f32 %v1490_v23 }
 0x588   : > { %v1941_v26 = vpop.eup %1940 }
 0x589   : > { %v1496_v27 = vmul.f32 %v1941_v26, %v1495_v25 }
 0x58b   : > { %1497 = vst.msk [vmem:[%s747_s1] sm:$0xff] %vm754_vm1, %v1496_v27 }
 0x58c PF: > { %s2599_s2 = sld [smem:[#allocation14_spill]]  ;;  %s2600_s29 = sld [smem:[#allocation12_spill]] }
 0x58d   : > { %s2601_s25 = sld [smem:[#allocation17_spill]] }
 0x592   : > { %p1901_p9 = scmp.ge.s32.totalorder %s2599_s2, 2  ;;  %s1558_s3 = sand.u32 1, %s2600_s29  }
 0x593   : > { %p2602_p7 = scmp.ne.s32.totalorder %s2601_s25, 0  ;;  %s1559_s24 = scalar_lea.sflag [#allocation5], %s1558_s3 }
 0x595   : > { %p1893_p8 = pnand %p1901_p9, %p2602_p7 }
 0x597   : > { %2047 = dma.done.wait (!%p1893_p8), %s1559_s24, 128  }
 0x598   : > { %2049 = vsyncadd (!%p1893_p8), %s1559_s24, 4294967168  ;;  %s1568_s23 = scalar_lea.sflag [#allocation8], %s1558_s3 }
 0x599   : > { %2051 = dma.done.wait (!%p1893_p8), %s1568_s23, 128  }
 0x59a   : > { %2053 = vsyncadd (!%p1893_p8), %s1568_s23, 4294967168  ;;  %s2603_s23 = sld [smem:[#allocation15_spill]]  ;;  %s2604_s0 = sld [smem:[#allocation13_spill]] }
 0x59b   : > { %s2605_s5 = sld [smem:[#allocation16_spill]]  ;;  %s2606_s30 = smov %s2060_s4 }
 0x5a0   : > { %p38_p11 = scmp.ge.s32.totalorder %s2603_s23, 4   ;;  %s2607_s4 = smov %s2604_s0 }
 0x5a1   : > { %s2608_s0 = smov %s2605_s5 }
 0x5a2   :  { %40 = sbr.rel (!%p38_p11) target bundleno = 20 (0x14), region = 175 }
 0x5a9   :  { %1573 = vsyncpa [#allocation4], 1 }
 0x5aa   :  { %1575 = vsyncpa [#allocation4 + $0x1], 1 }
 0x5ab   :  { %1576 = vsyncpa [#allocation5], 1 }
 0x5ac   :  { %1578 = vsyncpa [#allocation5 + $0x1], 1 }
 0x5ad   :  { %1579 = vsyncpa [#allocation8], 1 }
 0x5ae   :  { %1581 = vsyncpa [#allocation8 + $0x1], 1 }

</bundles_post_ra>
